<compile_context>
chip_gen: v6e
topology: v6e:2x2x1
jax: 0.10.0
libtpu: 0.0.40
codegen_flags: <defaults>
</compile_context>

<pallas_src>
import functools

import numpy as np

import jax
import jax.numpy as jnp
from jax.experimental import pallas as pl
from jax.experimental.pallas import tpu as pltpu

NEG_SLOPE = 0.01  # torch.nn.LeakyReLU default negative_slope


# ---------------------------------------------------------------------------
# Fused Pallas kernel: conv1 + lrelu + conv2 + lrelu + conv3 + scaled residual
# ---------------------------------------------------------------------------
def _masked_block_kernel(x_ref, m_ref, w0_ref, b0_ref, w1_ref, b1_ref,
                         w2_ref, b2_ref, s_ref, o_ref, xk_ref, *,
                         HW, B_tile, C_in_p, C_mid_p, C_out_p,
                         taps0, taps1, taps2):
    L = B_tile * HW

    def lrelu(v):
        return jnp.where(v >= 0.0, v, NEG_SLOPE * v)

    def conv(x, w_ref, b_ref, taps, c_p):
        # taps: static tuple of (flat_offset, mask_row) pairs; mask_row == -1
        # means the (0,0) center tap (no roll, no validity mask needed).
        n_taps = len(taps)
        if n_taps == 0:                      # degenerate fully-masked conv
            return jnp.zeros((b_ref.shape[0], L), jnp.float32) + b_ref[...]
        for t, (off, mrow) in enumerate(taps):
            if off == 0 and mrow < 0:
                tap = x
            else:
                tap = pltpu.roll(x, shift=(-off) % L, axis=1)  # XLU lane rotate
                if mrow >= 0:
                    tap = tap * m_ref[mrow:mrow + 1, :]        # hoisted mask
            # Direct write into the stacked-K slab (bounds live vregs per tap).
            xk_ref[t * c_p:(t + 1) * c_p, :] = tap
        # One MXU matmul per conv, bf16 operands, f32 accumulate.
        acc = jax.lax.dot_general(
            w_ref[...], xk_ref[:n_taps * c_p, :].astype(jnp.bfloat16),
            dimension_numbers=(((1,), (0,)), ((), ())),
            preferred_element_type=jnp.float32)
        return acc + b_ref[...]              # bias (Cout_p, 1) lane-broadcast

    # Input block is (B_tile, C_in_p, HW); present it lane-dense as
    # (C_in_p, B_tile*HW).  Rolls never contaminate across images because any
    # position whose shifted source falls outside its own image is zeroed by
    # the per-image validity mask (tiled B_tile times on the host).
    if B_tile == 1:
        xin = x_ref[0].astype(jnp.float32)
    else:
        xin = jnp.concatenate(
            [x_ref[b].astype(jnp.float32) for b in range(B_tile)], axis=-1)

    h = lrelu(conv(xin, w0_ref, b0_ref, taps0, C_in_p))   # VMEM/vregs only
    h = lrelu(conv(h, w1_ref, b1_ref, taps1, C_mid_p))    # VMEM/vregs only
    y = conv(h, w2_ref, b2_ref, taps2, C_mid_p)

    res = y + s_ref[...] * xin                             # fused residual (f32)
    if B_tile == 1:
        o_ref[0] = res.astype(o_ref.dtype)
    else:
        for b in range(B_tile):
            o_ref[b] = res[:, b * HW:(b + 1) * HW].astype(o_ref.dtype)


# ---------------------------------------------------------------------------
# One-time parameter preparation (hoisted out of the per-call path)
# ---------------------------------------------------------------------------
def _round_up(v, m):
    return ((v + m - 1) // m) * m


def prepare_masked_block(params, scales, H, W, batch_tile=1):
    """Mask weights, drop statically-zero taps, pad channels to sublane
    multiples, build stacked bf16 matmul weights / f32 biases, and precompute
    the per-tap 'same'-padding validity masks for images of size HxW."""
    (w0, b0, m0), (w1, b1, m1), (w2, b2, m2) = params
    C_in = w0.shape[1]
    C_mid = w0.shape[0]
    C_out = w2.shape[0]
    assert w1.shape[0] == C_mid and w1.shape[1] == C_mid and w2.shape[1] == C_mid
    assert C_out == C_in  # residual requires matching channels
    C_in_p = _round_up(C_in, 8)
    C_mid_p = _round_up(C_mid, 8)
    C_out_p = _round_up(C_out, 8)
    assert C_in_p == C_out_p

    HW = H * W
    L = batch_tile * HW

    # Pass 1: which taps survive the triangular mask (static drop of "future"
    # taps -- decided by the mask, not the random weights).
    def layer_taps(m):
        m_np = np.asarray(m)
        _, _, KH, KW = m_np.shape
        ph, pw = KH // 2, KW // 2
        return [(di - ph, dj - pw) for di in range(KH) for dj in range(KW)
                if np.any(m_np[:, :, di, dj])]

    taps_l = [layer_taps(m0), layer_taps(m1), layer_taps(m2)]

    # Unique non-center taps -> precomputed validity masks (host-side numpy),
    # tiled batch_tile times along the flat lane axis.
    uniq = sorted({t for taps in taps_l for t in taps if t != (0, 0)})
    q = np.arange(HW)
    row, col = q // W, q % W
    mask_rows = []
    for (dy, dx) in uniq:
        valid = ((row + dy >= 0) & (row + dy < H) &
                 (col + dx >= 0) & (col + dx < W)).astype(np.float32)
        mask_rows.append(np.tile(valid, batch_tile))
    n_uniq_p = _round_up(max(len(mask_rows), 1), 8)
    masks_np = np.ones((n_uniq_p, L), np.float32)
    for i, r in enumerate(mask_rows):
        masks_np[i] = r
    tap_row = {t: i for i, t in enumerate(uniq)}

    def prep_layer(w, b, m, taps, cin_p, cout_p):
        wm = np.asarray(w) * np.asarray(m)          # MaskedConv2d: weight *= mask
        cout_t, cin_t, KH, KW = wm.shape
        ph, pw = KH // 2, KW // 2
        cols, tap_desc = [], []
        for (dy, dx) in taps:
            blk = np.zeros((cout_p, cin_p), np.float32)
            blk[:cout_t, :cin_t] = wm[:, :, dy + ph, dx + pw]
            cols.append(blk)
            tap_desc.append((dy * W + dx, tap_row.get((dy, dx), -1)))
        if cols:
            w_mat = np.concatenate(cols, axis=1)    # (cout_p, n_taps*cin_p)
        else:
            w_mat = np.zeros((cout_p, cin_p), np.float32)
        b_col = np.zeros((cout_p, 1), np.float32)
        b_col[:cout_t, 0] = np.asarray(b)
        return (jnp.asarray(w_mat, jnp.bfloat16),   # bf16 MXU operands
                jnp.asarray(b_col, jnp.float32),
                tuple(tap_desc))

    w0m, b0c, t0 = prep_layer(w0, b0, m0, taps_l[0], C_in_p, C_mid_p)
    w1m, b1c, t1 = prep_layer(w1, b1, m1, taps_l[1], C_mid_p, C_mid_p)
    w2m, b2c, t2 = prep_layer(w2, b2, m2, taps_l[2], C_mid_p, C_out_p)

    k_max = max(max(len(t0), 1) * C_in_p,
                max(len(t1), 1) * C_mid_p,
                max(len(t2), 1) * C_mid_p)

    s_col = np.zeros((C_out_p, 1), np.float32)
    s_col[:C_out, 0] = np.asarray(scales)

    return {
        "layers": ((w0m, b0c), (w1m, b1c), (w2m, b2c)),
        "scales": jnp.asarray(s_col),
        "masks": jnp.asarray(masks_np),
        "taps": (t0, t1, t2),
        "c_in": C_in, "c_in_p": C_in_p,
        "c_mid_p": C_mid_p,
        "c_out": C_out, "c_out_p": C_out_p,
        "h": H, "w": W, "batch_tile": batch_tile,
        "k_max": k_max,
    }


# ---------------------------------------------------------------------------
# Forward wrapper (NCHW in -> NCHW out, one pallas_call for the whole block)
# ---------------------------------------------------------------------------
def masked_block_forward(x_nchw, prepared):
    N, C, H, W = x_nchw.shape
    assert (H, W) == (prepared["h"], prepared["w"])
    C_in, C_in_p = prepared["c_in"], prepared["c_in_p"]
    C_mid_p = prepared["c_mid_p"]
    C_out, C_out_p = prepared["c_out"], prepared["c_out_p"]
    assert C == C_in
    B_tile = prepared["batch_tile"]
    assert N % B_tile == 0
    HW = H * W
    L = B_tile * HW

    (w0, b0), (w1, b1), (w2, b2) = prepared["layers"]
    masks = prepared["masks"]
    s = prepared["scales"]
    t0, t1, t2 = prepared["taps"]
    k_max = prepared["k_max"]

    # Channel padding done once outside the kernel (keeps DMA blocks 8-sublane
    # aligned and removes the per-step in-kernel zero-pad copy).
    x_p = x_nchw
    if C_in_p > C_in:
        x_p = jnp.pad(x_nchw, ((0, 0), (0, C_in_p - C_in), (0, 0), (0, 0)))
    x_flat = x_p.reshape(N, C_in_p, HW)             # free collapse, stays NCHW

    kern = functools.partial(
        _masked_block_kernel, HW=HW, B_tile=B_tile,
        C_in_p=C_in_p, C_mid_p=C_mid_p, C_out_p=C_out_p,
        taps0=t0, taps1=t1, taps2=t2)

    flops = int(2 * N * HW * (C_mid_p * len(t0) * C_in_p
                              + C_mid_p * len(t1) * C_mid_p
                              + C_out_p * len(t2) * C_mid_p))
    bytes_accessed = int(x_flat.size * 4 + N * C_out_p * HW * 4
                         + (w0.size + w1.size + w2.size) * 2
                         + (b0.size + b1.size + b2.size
                            + s.size + masks.size) * 4)

    out = pl.pallas_call(
        kern,
        out_shape=jax.ShapeDtypeStruct((N, C_out_p, HW), x_nchw.dtype),
        grid=(N // B_tile,),
        in_specs=[
            pl.BlockSpec((B_tile, C_in_p, HW), lambda n: (n, 0, 0)),
            pl.BlockSpec(masks.shape, lambda n: (0, 0)),
            pl.BlockSpec(w0.shape, lambda n: (0, 0)),
            pl.BlockSpec(b0.shape, lambda n: (0, 0)),
            pl.BlockSpec(w1.shape, lambda n: (0, 0)),
            pl.BlockSpec(b1.shape, lambda n: (0, 0)),
            pl.BlockSpec(w2.shape, lambda n: (0, 0)),
            pl.BlockSpec(b2.shape, lambda n: (0, 0)),
            pl.BlockSpec(s.shape, lambda n: (0, 0)),
        ],
        out_specs=pl.BlockSpec((B_tile, C_out_p, HW), lambda n: (n, 0, 0)),
        scratch_shapes=[pltpu.VMEM((k_max, L), jnp.float32)],   # stacked-K slab
        compiler_params=pltpu.CompilerParams(
            dimension_semantics=("parallel",),
            vmem_limit_bytes=32 * 1024 * 1024),
        cost_estimate=pl.CostEstimate(
            flops=flops, transcendentals=0, bytes_accessed=bytes_accessed),
    )(x_flat, masks, w0, b0, w1, b1, w2, b2, s)

    return out[:, :C_out, :].reshape(N, C_out, H, W)


# ---------------------------------------------------------------------------
# Mask construction (mirrors functions.create_triangular_mask semantics)
# ---------------------------------------------------------------------------
def create_triangular_mask(cout_total, cin_total, kh, kw, in_group_size,
                           out_group_size, in_prefix, out_prefix,
                           include_target=True, reverse=False):
    # TODO(synk): source of `functions.create_triangular_mask` is not provided;
    # reconstructed as standard PixelCNN-style triangular mask (spatial
    # positions strictly before the center fully visible; at the center, a
    # group-wise triangular channel mask with include_target=True; prefix
    # channels treated as always-visible conditioning).
    ph, pw = kh // 2, kw // 2
    ii = jnp.arange(kh)[:, None]
    jj = jnp.arange(kw)[None, :]
    before_center = (ii < ph) | ((ii == ph) & (jj < pw))        # (kh, kw)
    center = (ii == ph) & (jj == pw)                            # (kh, kw)

    co = jnp.arange(cout_total)[:, None]
    ci = jnp.arange(cin_total)[None, :]
    in_is_prefix = ci < in_prefix
    out_is_prefix = co < out_prefix
    g_in = (ci - in_prefix) // in_group_size
    g_out = (co - out_prefix) // out_group_size
    if reverse:
        n_in_groups = (cin_total - in_prefix) // in_group_size
        n_out_groups = (cout_total - out_prefix) // out_group_size
        g_in = (n_in_groups - 1) - g_in
        g_out = (n_out_groups - 1) - g_out
    tri = (g_in <= g_out) if include_target else (g_in < g_out)
    chan = jnp.where(out_is_prefix, in_is_prefix, in_is_prefix | tri)  # (co,ci)

    mask = (before_center[None, None, :, :]
            | (center[None, None, :, :] & chan[:, :, None, None]))
    return mask.astype(jnp.float32)


# ---------------------------------------------------------------------------
# MaskedBlock parameter init (PyTorch-style (Cout, Cin, KH, KW) weights)
# ---------------------------------------------------------------------------
def init_masked_block_params(key, num_channels, multiplier, kernel_size,
                             group_size, prefix_size):
    C = num_channels
    layer_defs = [
        # (cin, cout, in_group_size, out_group_size)
        (C, multiplier * C, group_size, multiplier * group_size),
        (multiplier * C, multiplier * C, multiplier * group_size,
         multiplier * group_size),
        (multiplier * C, C, multiplier * group_size, group_size),
    ]
    params = []
    keys = jax.random.split(key, 2 * len(layer_defs))
    for idx, (cin, cout, igs, ogs) in enumerate(layer_defs):
        cin_t = prefix_size + cin
        cout_t = prefix_size + cout
        fan_in = cin_t * kernel_size * kernel_size
        bound = 1.0 / jnp.sqrt(jnp.float32(fan_in))
        w = jax.random.uniform(keys[2 * idx],
                               (cout_t, cin_t, kernel_size, kernel_size),
                               jnp.float32, -bound, bound)
        b = jax.random.uniform(keys[2 * idx + 1], (cout_t,), jnp.float32,
                               -bound, bound)
        mask = create_triangular_mask(cout_t, cin_t, kernel_size, kernel_size,
                                      igs, ogs, prefix_size, prefix_size,
                                      include_target=True, reverse=False)
        params.append((w, b, mask))
    scales = jnp.ones((prefix_size + C,), jnp.float32)   # self.scale=True
    return params, scales


# ---------------------------------------------------------------------------
# Plain-XLA reference of the same module (for a correctness check)
# ---------------------------------------------------------------------------
def masked_block_reference(x, params, scales):
    h = x
    for idx, (w, b, m) in enumerate(params):
        wm = w * m
        h = jax.lax.conv_general_dilated(
            h, wm, window_strides=(1, 1), padding="SAME",
            dimension_numbers=("NCHW", "OIHW", "NCHW"),
            precision=jax.lax.Precision.HIGHEST)
        h = h + b[None, :, None, None]
        if idx < len(params) - 1:
            h = jnp.where(h >= 0.0, h, NEG_SLOPE * h)
    return scales[None, :, None, None] * x + h


if __name__ == "__main__":
    num_channels = 4
    multiplier = 2
    kernel_size = 3
    group_size = 1
    prefix_size = 2
    N, H, W = 4, 16, 16

    key = jax.random.PRNGKey(0)
    kx, kp, ks = jax.random.split(key, 3)
    # module input has prefix_size + num_channels channels (NCHW)
    x = jax.random.normal(kx, (N, prefix_size + num_channels, H, W),
                          jnp.float32)
    params, scales = init_masked_block_params(kp, num_channels, multiplier,
                                              kernel_size, group_size,
                                              prefix_size)
    # perturb the (learnable) residual scales so the scaled-residual path is
    # actually exercised by the check
    scales = scales + 0.25 * jax.random.normal(ks, scales.shape, jnp.float32)

    # one-time prep: masked/stacked bf16 weights, hoisted validity masks,
    # 2 images per grid step (lane width = 2*H*W)
    prepared = prepare_masked_block(params, scales, H, W, batch_tile=2)
    out = masked_block_forward(x, prepared)
    out = jax.block_until_ready(out)
    assert out.shape == x.shape and out.dtype == x.dtype

    ref = masked_block_reference(x, params, scales)
    err = float(jnp.max(jnp.abs(out - ref)))
    # bf16 MXU operands vs. f32 HIGHEST reference -> relaxed tolerance
    assert err < 2e-2, f"kernel/reference mismatch: max abs err = {err}"

    print("KERNEL_OK")
</pallas_src>

<mosaic_0001>
module attributes {stable_mosaic.version = 11 : i64} {
  func.func @_masked_block_kernel(%arg0: i32, %arg1: memref<2x8x256xf32, #tpu.memory_space<vmem>>, %arg2: memref<8x512xf32, #tpu.memory_space<vmem>>, %arg3: memref<16x40xbf16, #tpu.memory_space<vmem>>, %arg4: memref<16x1xf32, #tpu.memory_space<vmem>>, %arg5: memref<16x80xbf16, #tpu.memory_space<vmem>>, %arg6: memref<16x1xf32, #tpu.memory_space<vmem>>, %arg7: memref<8x80xbf16, #tpu.memory_space<vmem>>, %arg8: memref<8x1xf32, #tpu.memory_space<vmem>>, %arg9: memref<8x1xf32, #tpu.memory_space<vmem>>, %arg10: memref<2x8x256xf32, #tpu.memory_space<vmem>>, %arg11: memref<80x512xf32, #tpu.memory_space<vmem>>) attributes {dimension_semantics = [#tpu.dimension_semantics<parallel>], iteration_bounds = array<i64: 2>, scalar_prefetch = 0 : i64, scratch_operands = 1 : i64, tpu.core_type = #tpu.core_type<tc>, window_params = [{transform_indices = @transform_0, window_bounds = array<i64: 2, 8, 256>}, {pipeline_mode = #tpu.pipeline_mode<synchronous>, transform_indices = @transform_1, window_bounds = array<i64: 8, 512>}, {pipeline_mode = #tpu.pipeline_mode<synchronous>, transform_indices = @transform_2, window_bounds = array<i64: 16, 40>}, {pipeline_mode = #tpu.pipeline_mode<synchronous>, transform_indices = @transform_3, window_bounds = array<i64: 16, 1>}, {pipeline_mode = #tpu.pipeline_mode<synchronous>, transform_indices = @transform_4, window_bounds = array<i64: 16, 80>}, {pipeline_mode = #tpu.pipeline_mode<synchronous>, transform_indices = @transform_5, window_bounds = array<i64: 16, 1>}, {pipeline_mode = #tpu.pipeline_mode<synchronous>, transform_indices = @transform_6, window_bounds = array<i64: 8, 80>}, {pipeline_mode = #tpu.pipeline_mode<synchronous>, transform_indices = @transform_7, window_bounds = array<i64: 8, 1>}, {pipeline_mode = #tpu.pipeline_mode<synchronous>, transform_indices = @transform_8, window_bounds = array<i64: 8, 1>}, {transform_indices = @transform_9, window_bounds = array<i64: 2, 8, 256>}]} {
    %c0 = arith.constant 0 : index
    %c0_0 = arith.constant 0 : index
    %c0_1 = arith.constant 0 : index
    %0 = vector.load %arg1[%c0, %c0_0, %c0_1] : memref<2x8x256xf32, #tpu.memory_space<vmem>>, vector<1x8x256xf32>
    %1 = vector.shape_cast %0 : vector<1x8x256xf32> to vector<8x256xf32>
    %c1 = arith.constant 1 : index
    %c0_2 = arith.constant 0 : index
    %c0_3 = arith.constant 0 : index
    %2 = vector.load %arg1[%c1, %c0_2, %c0_3] : memref<2x8x256xf32, #tpu.memory_space<vmem>>, vector<1x8x256xf32>
    %3 = vector.shape_cast %2 : vector<1x8x256xf32> to vector<8x256xf32>
    %4 = tpu.concatenate %1, %3 in 1 : vector<8x256xf32>, vector<8x256xf32> -> vector<8x512xf32>
    %c17_i32 = arith.constant 17 : i32
    %5 = tpu.dynamic_rotate %4 by %c17_i32 dim 1 : vector<8x512xf32>, i32 -> vector<8x512xf32>
    %c0_4 = arith.constant 0 : index
    %c0_5 = arith.constant 0 : index
    %6 = vector.load %arg2[%c0_4, %c0_5] : memref<8x512xf32, #tpu.memory_space<vmem>>, vector<1x512xf32>
    %7 = vector.broadcast %6 : vector<1x512xf32> to vector<8x512xf32>
    %8 = arith.mulf %5, %7 : vector<8x512xf32>
    %c0_6 = arith.constant 0 : index
    %c0_7 = arith.constant 0 : index
    %9 = vector.load %arg11[%c0_6, %c0_7] : memref<80x512xf32, #tpu.memory_space<vmem>>, vector<8x512xf32>
    tpu.vector_store %arg11[%c0_6, %c0_7], %8 {strides = array<i32>} : memref<80x512xf32, #tpu.memory_space<vmem>>, vector<8x512xf32>,
    %c16_i32 = arith.constant 16 : i32
    %10 = tpu.dynamic_rotate %4 by %c16_i32 dim 1 : vector<8x512xf32>, i32 -> vector<8x512xf32>
    %c1_8 = arith.constant 1 : index
    %c0_9 = arith.constant 0 : index
    %11 = vector.load %arg2[%c1_8, %c0_9] : memref<8x512xf32, #tpu.memory_space<vmem>>, vector<1x512xf32>
    %12 = vector.broadcast %11 : vector<1x512xf32> to vector<8x512xf32>
    %13 = arith.mulf %10, %12 : vector<8x512xf32>
    %c8 = arith.constant 8 : index
    %c0_10 = arith.constant 0 : index
    %14 = vector.load %arg11[%c8, %c0_10] : memref<80x512xf32, #tpu.memory_space<vmem>>, vector<8x512xf32>
    tpu.vector_store %arg11[%c8, %c0_10], %13 {strides = array<i32>} : memref<80x512xf32, #tpu.memory_space<vmem>>, vector<8x512xf32>,
    %c15_i32 = arith.constant 15 : i32
    %15 = tpu.dynamic_rotate %4 by %c15_i32 dim 1 : vector<8x512xf32>, i32 -> vector<8x512xf32>
    %c2 = arith.constant 2 : index
    %c0_11 = arith.constant 0 : index
    %16 = vector.load %arg2[%c2, %c0_11] : memref<8x512xf32, #tpu.memory_space<vmem>>, vector<1x512xf32>
    %17 = vector.broadcast %16 : vector<1x512xf32> to vector<8x512xf32>
    %18 = arith.mulf %15, %17 : vector<8x512xf32>
    %c16 = arith.constant 16 : index
    %c0_12 = arith.constant 0 : index
    %19 = vector.load %arg11[%c16, %c0_12] : memref<80x512xf32, #tpu.memory_space<vmem>>, vector<8x512xf32>
    tpu.vector_store %arg11[%c16, %c0_12], %18 {strides = array<i32>} : memref<80x512xf32, #tpu.memory_space<vmem>>, vector<8x512xf32>,
    %c1_i32 = arith.constant 1 : i32
    %20 = tpu.dynamic_rotate %4 by %c1_i32 dim 1 : vector<8x512xf32>, i32 -> vector<8x512xf32>
    %c3 = arith.constant 3 : index
    %c0_13 = arith.constant 0 : index
    %21 = vector.load %arg2[%c3, %c0_13] : memref<8x512xf32, #tpu.memory_space<vmem>>, vector<1x512xf32>
    %22 = vector.broadcast %21 : vector<1x512xf32> to vector<8x512xf32>
    %23 = arith.mulf %20, %22 : vector<8x512xf32>
    %c24 = arith.constant 24 : index
    %c0_14 = arith.constant 0 : index
    %24 = vector.load %arg11[%c24, %c0_14] : memref<80x512xf32, #tpu.memory_space<vmem>>, vector<8x512xf32>
    tpu.vector_store %arg11[%c24, %c0_14], %23 {strides = array<i32>} : memref<80x512xf32, #tpu.memory_space<vmem>>, vector<8x512xf32>,
    %c32 = arith.constant 32 : index
    %c0_15 = arith.constant 0 : index
    %25 = vector.load %arg11[%c32, %c0_15] : memref<80x512xf32, #tpu.memory_space<vmem>>, vector<8x512xf32>
    tpu.vector_store %arg11[%c32, %c0_15], %4 {strides = array<i32>} : memref<80x512xf32, #tpu.memory_space<vmem>>, vector<8x512xf32>,
    %c0_16 = arith.constant 0 : index
    %c0_17 = arith.constant 0 : index
    %26 = vector.load %arg3[%c0_16, %c0_17] : memref<16x40xbf16, #tpu.memory_space<vmem>>, vector<16x40xbf16>
    %c0_18 = arith.constant 0 : index
    %c0_19 = arith.constant 0 : index
    %27 = vector.load %arg11[%c0_18, %c0_19] : memref<80x512xf32, #tpu.memory_space<vmem>>, vector<40x512xf32>
    %28 = arith.truncf %27 : vector<40x512xf32> to vector<40x512xbf16>
    %cst = arith.constant dense<0.000000e+00> : vector<16x512xf32>
    %29 = tpu.matmul %26, %28, %cst {dimension_numbers = #tpu.dot_dimension_numbers<[1], [0], [0], [1], [0, 0, 1, 1], [], []>} : vector<16x40xbf16>, vector<40x512xbf16>, vector<16x512xf32> -> vector<16x512xf32>
    %c0_20 = arith.constant 0 : index
    %c0_21 = arith.constant 0 : index
    %30 = vector.load %arg4[%c0_20, %c0_21] : memref<16x1xf32, #tpu.memory_space<vmem>>, vector<16x1xf32>
    %31 = vector.broadcast %30 : vector<16x1xf32> to vector<16x512xf32>
    %32 = arith.addf %29, %31 : vector<16x512xf32>
    %cst_22 = arith.constant 0.000000e+00 : f32
    %33 = vector.broadcast %cst_22 : f32 to vector<16x512xf32>
    %34 = arith.cmpf oge, %32, %33 : vector<16x512xf32>
    %cst_23 = arith.constant 0.00999999977 : f32
    %35 = vector.broadcast %cst_23 : f32 to vector<16x512xf32>
    %36 = arith.mulf %35, %32 : vector<16x512xf32>
    %37 = arith.select %34, %32, %36 : vector<16x512xi1>, vector<16x512xf32>
    %c17_i32_24 = arith.constant 17 : i32
    %38 = tpu.dynamic_rotate %37 by %c17_i32_24 dim 1 : vector<16x512xf32>, i32 -> vector<16x512xf32>
    %c0_25 = arith.constant 0 : index
    %c0_26 = arith.constant 0 : index
    %39 = vector.load %arg2[%c0_25, %c0_26] : memref<8x512xf32, #tpu.memory_space<vmem>>, vector<1x512xf32>
    %40 = vector.broadcast %39 : vector<1x512xf32> to vector<16x512xf32>
    %41 = arith.mulf %38, %40 : vector<16x512xf32>
    %c0_27 = arith.constant 0 : index
    %c0_28 = arith.constant 0 : index
    %42 = vector.load %arg11[%c0_27, %c0_28] : memref<80x512xf32, #tpu.memory_space<vmem>>, vector<16x512xf32>
    tpu.vector_store %arg11[%c0_27, %c0_28], %41 {strides = array<i32>} : memref<80x512xf32, #tpu.memory_space<vmem>>, vector<16x512xf32>,
    %c16_i32_29 = arith.constant 16 : i32
    %43 = tpu.dynamic_rotate %37 by %c16_i32_29 dim 1 : vector<16x512xf32>, i32 -> vector<16x512xf32>
    %c1_30 = arith.constant 1 : index
    %c0_31 = arith.constant 0 : index
    %44 = vector.load %arg2[%c1_30, %c0_31] : memref<8x512xf32, #tpu.memory_space<vmem>>, vector<1x512xf32>
    %45 = vector.broadcast %44 : vector<1x512xf32> to vector<16x512xf32>
    %46 = arith.mulf %43, %45 : vector<16x512xf32>
    %c16_32 = arith.constant 16 : index
    %c0_33 = arith.constant 0 : index
    %47 = vector.load %arg11[%c16_32, %c0_33] : memref<80x512xf32, #tpu.memory_space<vmem>>, vector<16x512xf32>
    tpu.vector_store %arg11[%c16_32, %c0_33], %46 {strides = array<i32>} : memref<80x512xf32, #tpu.memory_space<vmem>>, vector<16x512xf32>,
    %c15_i32_34 = arith.constant 15 : i32
    %48 = tpu.dynamic_rotate %37 by %c15_i32_34 dim 1 : vector<16x512xf32>, i32 -> vector<16x512xf32>
    %c2_35 = arith.constant 2 : index
    %c0_36 = arith.constant 0 : index
    %49 = vector.load %arg2[%c2_35, %c0_36] : memref<8x512xf32, #tpu.memory_space<vmem>>, vector<1x512xf32>
    %50 = vector.broadcast %49 : vector<1x512xf32> to vector<16x512xf32>
    %51 = arith.mulf %48, %50 : vector<16x512xf32>
    %c32_37 = arith.constant 32 : index
    %c0_38 = arith.constant 0 : index
    %52 = vector.load %arg11[%c32_37, %c0_38] : memref<80x512xf32, #tpu.memory_space<vmem>>, vector<16x512xf32>
    tpu.vector_store %arg11[%c32_37, %c0_38], %51 {strides = array<i32>} : memref<80x512xf32, #tpu.memory_space<vmem>>, vector<16x512xf32>,
    %c1_i32_39 = arith.constant 1 : i32
    %53 = tpu.dynamic_rotate %37 by %c1_i32_39 dim 1 : vector<16x512xf32>, i32 -> vector<16x512xf32>
    %c3_40 = arith.constant 3 : index
    %c0_41 = arith.constant 0 : index
    %54 = vector.load %arg2[%c3_40, %c0_41] : memref<8x512xf32, #tpu.memory_space<vmem>>, vector<1x512xf32>
    %55 = vector.broadcast %54 : vector<1x512xf32> to vector<16x512xf32>
    %56 = arith.mulf %53, %55 : vector<16x512xf32>
    %c48 = arith.constant 48 : index
    %c0_42 = arith.constant 0 : index
    %57 = vector.load %arg11[%c48, %c0_42] : memref<80x512xf32, #tpu.memory_space<vmem>>, vector<16x512xf32>
    tpu.vector_store %arg11[%c48, %c0_42], %56 {strides = array<i32>} : memref<80x512xf32, #tpu.memory_space<vmem>>, vector<16x512xf32>,
    %c64 = arith.constant 64 : index
    %c0_43 = arith.constant 0 : index
    %58 = vector.load %arg11[%c64, %c0_43] : memref<80x512xf32, #tpu.memory_space<vmem>>, vector<16x512xf32>
    tpu.vector_store %arg11[%c64, %c0_43], %37 {strides = array<i32>} : memref<80x512xf32, #tpu.memory_space<vmem>>, vector<16x512xf32>,
    %c0_44 = arith.constant 0 : index
    %c0_45 = arith.constant 0 : index
    %59 = vector.load %arg5[%c0_44, %c0_45] : memref<16x80xbf16, #tpu.memory_space<vmem>>, vector<16x80xbf16>
    %c0_46 = arith.constant 0 : index
    %c0_47 = arith.constant 0 : index
    %60 = vector.load %arg11[%c0_46, %c0_47] : memref<80x512xf32, #tpu.memory_space<vmem>>, vector<80x512xf32>
    %61 = arith.truncf %60 : vector<80x512xf32> to vector<80x512xbf16>
    %cst_48 = arith.constant dense<0.000000e+00> : vector<16x512xf32>
    %62 = tpu.matmul %59, %61, %cst_48 {dimension_numbers = #tpu.dot_dimension_numbers<[1], [0], [0], [1], [0, 0, 1, 1], [], []>} : vector<16x80xbf16>, vector<80x512xbf16>, vector<16x512xf32> -> vector<16x512xf32>
    %c0_49 = arith.constant 0 : index
    %c0_50 = arith.constant 0 : index
    %63 = vector.load %arg6[%c0_49, %c0_50] : memref<16x1xf32, #tpu.memory_space<vmem>>, vector<16x1xf32>
    %64 = vector.broadcast %63 : vector<16x1xf32> to vector<16x512xf32>
    %65 = arith.addf %62, %64 : vector<16x512xf32>
    %cst_51 = arith.constant 0.000000e+00 : f32
    %66 = vector.broadcast %cst_51 : f32 to vector<16x512xf32>
    %67 = arith.cmpf oge, %65, %66 : vector<16x512xf32>
    %cst_52 = arith.constant 0.00999999977 : f32
    %68 = vector.broadcast %cst_52 : f32 to vector<16x512xf32>
    %69 = arith.mulf %68, %65 : vector<16x512xf32>
    %70 = arith.select %67, %65, %69 : vector<16x512xi1>, vector<16x512xf32>
    %c17_i32_53 = arith.constant 17 : i32
    %71 = tpu.dynamic_rotate %70 by %c17_i32_53 dim 1 : vector<16x512xf32>, i32 -> vector<16x512xf32>
    %c0_54 = arith.constant 0 : index
    %c0_55 = arith.constant 0 : index
    %72 = vector.load %arg2[%c0_54, %c0_55] : memref<8x512xf32, #tpu.memory_space<vmem>>, vector<1x512xf32>
    %73 = vector.broadcast %72 : vector<1x512xf32> to vector<16x512xf32>
    %74 = arith.mulf %71, %73 : vector<16x512xf32>
    %c0_56 = arith.constant 0 : index
    %c0_57 = arith.constant 0 : index
    %75 = vector.load %arg11[%c0_56, %c0_57] : memref<80x512xf32, #tpu.memory_space<vmem>>, vector<16x512xf32>
    tpu.vector_store %arg11[%c0_56, %c0_57], %74 {strides = array<i32>} : memref<80x512xf32, #tpu.memory_space<vmem>>, vector<16x512xf32>,
    %c16_i32_58 = arith.constant 16 : i32
    %76 = tpu.dynamic_rotate %70 by %c16_i32_58 dim 1 : vector<16x512xf32>, i32 -> vector<16x512xf32>
    %c1_59 = arith.constant 1 : index
    %c0_60 = arith.constant 0 : index
    %77 = vector.load %arg2[%c1_59, %c0_60] : memref<8x512xf32, #tpu.memory_space<vmem>>, vector<1x512xf32>
    %78 = vector.broadcast %77 : vector<1x512xf32> to vector<16x512xf32>
    %79 = arith.mulf %76, %78 : vector<16x512xf32>
    %c16_61 = arith.constant 16 : index
    %c0_62 = arith.constant 0 : index
    %80 = vector.load %arg11[%c16_61, %c0_62] : memref<80x512xf32, #tpu.memory_space<vmem>>, vector<16x512xf32>
    tpu.vector_store %arg11[%c16_61, %c0_62], %79 {strides = array<i32>} : memref<80x512xf32, #tpu.memory_space<vmem>>, vector<16x512xf32>,
    %c15_i32_63 = arith.constant 15 : i32
    %81 = tpu.dynamic_rotate %70 by %c15_i32_63 dim 1 : vector<16x512xf32>, i32 -> vector<16x512xf32>
    %c2_64 = arith.constant 2 : index
    %c0_65 = arith.constant 0 : index
    %82 = vector.load %arg2[%c2_64, %c0_65] : memref<8x512xf32, #tpu.memory_space<vmem>>, vector<1x512xf32>
    %83 = vector.broadcast %82 : vector<1x512xf32> to vector<16x512xf32>
    %84 = arith.mulf %81, %83 : vector<16x512xf32>
    %c32_66 = arith.constant 32 : index
    %c0_67 = arith.constant 0 : index
    %85 = vector.load %arg11[%c32_66, %c0_67] : memref<80x512xf32, #tpu.memory_space<vmem>>, vector<16x512xf32>
    tpu.vector_store %arg11[%c32_66, %c0_67], %84 {strides = array<i32>} : memref<80x512xf32, #tpu.memory_space<vmem>>, vector<16x512xf32>,
    %c1_i32_68 = arith.constant 1 : i32
    %86 = tpu.dynamic_rotate %70 by %c1_i32_68 dim 1 : vector<16x512xf32>, i32 -> vector<16x512xf32>
    %c3_69 = arith.constant 3 : index
    %c0_70 = arith.constant 0 : index
    %87 = vector.load %arg2[%c3_69, %c0_70] : memref<8x512xf32, #tpu.memory_space<vmem>>, vector<1x512xf32>
    %88 = vector.broadcast %87 : vector<1x512xf32> to vector<16x512xf32>
    %89 = arith.mulf %86, %88 : vector<16x512xf32>
    %c48_71 = arith.constant 48 : index
    %c0_72 = arith.constant 0 : index
    %90 = vector.load %arg11[%c48_71, %c0_72] : memref<80x512xf32, #tpu.memory_space<vmem>>, vector<16x512xf32>
    tpu.vector_store %arg11[%c48_71, %c0_72], %89 {strides = array<i32>} : memref<80x512xf32, #tpu.memory_space<vmem>>, vector<16x512xf32>,
    %c64_73 = arith.constant 64 : index
    %c0_74 = arith.constant 0 : index
    %91 = vector.load %arg11[%c64_73, %c0_74] : memref<80x512xf32, #tpu.memory_space<vmem>>, vector<16x512xf32>
    tpu.vector_store %arg11[%c64_73, %c0_74], %70 {strides = array<i32>} : memref<80x512xf32, #tpu.memory_space<vmem>>, vector<16x512xf32>,
    %c0_75 = arith.constant 0 : index
    %c0_76 = arith.constant 0 : index
    %92 = vector.load %arg7[%c0_75, %c0_76] : memref<8x80xbf16, #tpu.memory_space<vmem>>, vector<8x80xbf16>
    %c0_77 = arith.constant 0 : index
    %c0_78 = arith.constant 0 : index
    %93 = vector.load %arg11[%c0_77, %c0_78] : memref<80x512xf32, #tpu.memory_space<vmem>>, vector<80x512xf32>
    %94 = arith.truncf %93 : vector<80x512xf32> to vector<80x512xbf16>
    %cst_79 = arith.constant dense<0.000000e+00> : vector<8x512xf32>
    %95 = tpu.matmul %92, %94, %cst_79 {dimension_numbers = #tpu.dot_dimension_numbers<[1], [0], [0], [1], [0, 0, 1, 1], [], []>} : vector<8x80xbf16>, vector<80x512xbf16>, vector<8x512xf32> -> vector<8x512xf32>
    %c0_80 = arith.constant 0 : index
    %c0_81 = arith.constant 0 : index
    %96 = vector.load %arg8[%c0_80, %c0_81] : memref<8x1xf32, #tpu.memory_space<vmem>>, vector<8x1xf32>
    %97 = vector.broadcast %96 : vector<8x1xf32> to vector<8x512xf32>
    %98 = arith.addf %95, %97 : vector<8x512xf32>
    %c0_82 = arith.constant 0 : index
    %c0_83 = arith.constant 0 : index
    %99 = vector.load %arg9[%c0_82, %c0_83] : memref<8x1xf32, #tpu.memory_space<vmem>>, vector<8x1xf32>
    %100 = vector.broadcast %99 : vector<8x1xf32> to vector<8x512xf32>
    %101 = arith.mulf %100, %4 : vector<8x512xf32>
    %102 = arith.addf %98, %101 : vector<8x512xf32>
    %103 = vector.extract_strided_slice %102 {offsets = [0, 0], sizes = [8, 256], strides = [1, 1]} : vector<8x512xf32> to vector<8x256xf32>
    %c0_84 = arith.constant 0 : index
    %c0_85 = arith.constant 0 : index
    %c0_86 = arith.constant 0 : index
    %104 = vector.load %arg10[%c0_84, %c0_85, %c0_86] : memref<2x8x256xf32, #tpu.memory_space<vmem>>, vector<1x8x256xf32>
    %105 = vector.shape_cast %104 : vector<1x8x256xf32> to vector<8x256xf32>
    %106 = vector.shape_cast %103 : vector<8x256xf32> to vector<1x8x256xf32>
    tpu.vector_store %arg10[%c0_84, %c0_85, %c0_86], %106 {strides = array<i32>} : memref<2x8x256xf32, #tpu.memory_space<vmem>>, vector<1x8x256xf32>,
    %107 = vector.extract_strided_slice %102 {offsets = [0, 256], sizes = [8, 256], strides = [1, 1]} : vector<8x512xf32> to vector<8x256xf32>
    %c1_87 = arith.constant 1 : index
    %c0_88 = arith.constant 0 : index
    %c0_89 = arith.constant 0 : index
    %108 = vector.load %arg10[%c1_87, %c0_88, %c0_89] : memref<2x8x256xf32, #tpu.memory_space<vmem>>, vector<1x8x256xf32>
    %109 = vector.shape_cast %108 : vector<1x8x256xf32> to vector<8x256xf32>
    %110 = vector.shape_cast %107 : vector<8x256xf32> to vector<1x8x256xf32>
    tpu.vector_store %arg10[%c1_87, %c0_88, %c0_89], %110 {strides = array<i32>} : memref<2x8x256xf32, #tpu.memory_space<vmem>>, vector<1x8x256xf32>,
    return
  }
  func.func @transform_0(%arg0: i32) -> (i32, i32, i32) {
    %c0_i32 = arith.constant 0 : i32
    %c0_i32_0 = arith.constant 0 : i32
    %c0_i32_1 = arith.constant 0 : i32
    return %arg0, %c0_i32, %c0_i32_0 : i32, i32, i32
  }
  func.func @transform_1(%arg0: i32) -> (i32, i32) {
    %c0_i32 = arith.constant 0 : i32
    %c0_i32_0 = arith.constant 0 : i32
    %c0_i32_1 = arith.constant 0 : i32
    return %c0_i32, %c0_i32_0 : i32, i32
  }
  func.func @transform_2(%arg0: i32) -> (i32, i32) {
    %c0_i32 = arith.constant 0 : i32
    %c0_i32_0 = arith.constant 0 : i32
    %c0_i32_1 = arith.constant 0 : i32
    return %c0_i32, %c0_i32_0 : i32, i32
  }
  func.func @transform_3(%arg0: i32) -> (i32, i32) {
    %c0_i32 = arith.constant 0 : i32
    %c0_i32_0 = arith.constant 0 : i32
    %c0_i32_1 = arith.constant 0 : i32
    return %c0_i32, %c0_i32_0 : i32, i32
  }
  func.func @transform_4(%arg0: i32) -> (i32, i32) {
    %c0_i32 = arith.constant 0 : i32
    %c0_i32_0 = arith.constant 0 : i32
    %c0_i32_1 = arith.constant 0 : i32
    return %c0_i32, %c0_i32_0 : i32, i32
  }
  func.func @transform_5(%arg0: i32) -> (i32, i32) {
    %c0_i32 = arith.constant 0 : i32
    %c0_i32_0 = arith.constant 0 : i32
    %c0_i32_1 = arith.constant 0 : i32
    return %c0_i32, %c0_i32_0 : i32, i32
  }
  func.func @transform_6(%arg0: i32) -> (i32, i32) {
    %c0_i32 = arith.constant 0 : i32
    %c0_i32_0 = arith.constant 0 : i32
    %c0_i32_1 = arith.constant 0 : i32
    return %c0_i32, %c0_i32_0 : i32, i32
  }
  func.func @transform_7(%arg0: i32) -> (i32, i32) {
    %c0_i32 = arith.constant 0 : i32
    %c0_i32_0 = arith.constant 0 : i32
    %c0_i32_1 = arith.constant 0 : i32
    return %c0_i32, %c0_i32_0 : i32, i32
  }
  func.func @transform_8(%arg0: i32) -> (i32, i32) {
    %c0_i32 = arith.constant 0 : i32
    %c0_i32_0 = arith.constant 0 : i32
    %c0_i32_1 = arith.constant 0 : i32
    return %c0_i32, %c0_i32_0 : i32, i32
  }
  func.func @transform_9(%arg0: i32) -> (i32, i32, i32) {
    %c0_i32 = arith.constant 0 : i32
    %c0_i32_0 = arith.constant 0 : i32
    %c0_i32_1 = arith.constant 0 : i32
    return %arg0, %c0_i32, %c0_i32_0 : i32, i32, i32
  }
}

</mosaic_0001>

<bundles_post_ra>
// kernel: tpu_custom_call.1
= control target key start
LH: loop header
LB: loop body
LE: loop exit
PB: predicated region body
PF: predicated region fallthrough
CT: control target
= control target key end

     0   :  { %14 = vsyncpa [#allocation4], 0  ;;  %s2578_s0 = inlined_call_operand.hbm [shape: f32[4,8,256], index: 0, kind: input, shape index: {}]   ;;  %s2579_s1 = inlined_call_operand.vmem [shape: f32[8,512], index: 1, kind: input, shape index: {}]   ;;  %s2580_s2 = inlined_call_operand.vmem [shape: bf16[16,40], index: 2, kind: input, shape index: {}]   ;;  %s2581_s3 = inlined_call_operand.vmem [shape: f32[16,1], index: 3, kind: input, shape index: {}]   ;;  %s2582_s4 = inlined_call_operand.vmem [shape: bf16[16,80], index: 4, kind: input, shape index: {}]   ;;  %s2583_s5 = inlined_call_operand.vmem [shape: f32[16,1], index: 5, kind: input, shape index: {}]   ;;  %s2584_s6 = inlined_call_operand.vmem [shape: bf16[8,80], index: 6, kind: input, shape index: {}]   ;;  %s2585_s7 = inlined_call_operand.vmem [shape: f32[8,1], index: 7, kind: input, shape index: {}]   ;;  %s2586_s8 = inlined_call_operand.vmem [shape: f32[8,1], index: 8, kind: input, shape index: {}]   ;;  %s2587_s9 = inlined_call_operand.hbm [shape: f32[4,8,256], index: 9, kind: output, shape index: {}]  }
   0x1   :  { %16 = vsyncpa [#allocation4 + $0x1], 0 }
   0x2   :  { %17 = vsyncpa [#allocation5], 0 }
   0x3   :  { %19 = vsyncpa [#allocation5 + $0x1], 0  ;;  %s1942_s30 = smov 0   ;;  %s1944_s10 = smov 0  }
   0x4   :  { %s1946_s11 = smov 0   ;;  %s1948_s12 = smov 0  }
   0x5 LB: > { %2591 = sst [smem:[#allocation9_spill]] %s1876_s11  ;;  %s1963_s13 = sadd.s32 4294967295, %s1880_s12   ;;  %s1880_s12 = sphi %s1948_s12, %s2606_s12   ;;  %s1876_s11 = sphi %s1946_s11, %s2603_s11   ;;  %s1872_s10 = sphi %s1944_s10, %s2605_s10   ;;  %s1868_s30 = sphi %s1942_s30, %s2604_s30  }
   0x6   : > { %s1683_s14 = sadd.s32 4294967294, %s1880_s12   ;;  %s1967_s15 = sadd.s32 1, %s1880_s12  }
   0x7   : > { %s32_s16 = sadd.s32 1, %s1876_s11  ;;  %s29_s17 = ssub.s32 %s1880_s12, %s1967_s15 }
   0x8   : > { %p39_p0 = scmp.ne.s32.totalorder %s1876_s11, %s1872_s10  ;;  %p30_p1 = scmp.eq.s32.totalorder %s29_s17, 0 }
   0x9   : > { %p40_p2 = scmp.eq.s32.totalorder %s1880_s12, 0  ;;  %p45_p3 = scmp.ne.s32.totalorder %s1872_s10, %s1868_s30 }
   0xa   : > { %p46_p4 = scmp.eq.s32.totalorder %s1963_s13, 0  ;;  %p237_p7 = scmp.eq.s32.totalorder %s1963_s13, 1 }
   0xb   : > { %s1979_s18 = scalar_select %p30_p1, %s1876_s11, %s32_s16  }
   0xc   : > { %p1981_p5 = por %p40_p2, %p39_p0  ;;  %p1985_p6 = por %p46_p4, %p45_p3 }
   0xd   : > { %2592 = sst [smem:[#allocation10_spill]] %s1979_s18  ;;  %p243_p8 = scmp.eq.s32.totalorder %s1683_s14, 1 }
   0xe   : > { %s2594_s20 = scalar_select %p1985_p6, 1, 0 }
   0xf   : > { %p1738_p10 = scmp.lt.s32.totalorder %s1880_s12, 2  ;;  %p1992_p11 = por %p237_p7, %p39_p0 }
  0x10   : > { %p1996_p12 = por %p243_p8, %p45_p3  ;;  %s287_s23 = sand.u32 1, %s1876_s11  }
  0x11   : > { %s2595_s21 = scalar_select %p1992_p11, 1, 0 }
  0x12   : > { %s2596_s22 = scalar_select %p1996_p12, 1, 0 }
  0x13   : > { %s1723_s24 = sshll.u32 %s1880_s12, 9  ;;  %s1686_s25 = sshll.u32 %s287_s23, 5 }
  0x14   : > { %s2005_s28 = scalar_lea.hbm %s2578_s0, %s1723_s24  ;;  %s291_s29 = scalar_lea.vmem [#allocation3], %s1686_s25 }
  0x15   : > { %s299_s14 = sshll.u32 %s291_s29, 4  ;;  %p2009_p13 = pnand %p1738_p10, %p1981_p5  ;;  %s2013_s14 = int_to_ptr.vmem [resolvable:$true] %s299_s14 }
  0x16   : > { %s2015_s17 = scalar_lea.sflag [#allocation4], %s287_s23  ;;  %s1788_s18 = scalar_lea.hbm %s2005_s28, 512 }
  0x17   : > { %p1789_p0 = scmp.ne.s32.totalorder %s2005_s28, %s1788_s18  ;;  %p1790_p1 = pneg %p2009_p13 }
  0x18   : > { %s1793_s25 = scalar_lea.hbm %s2578_s0, 1024  ;;  %p1794_p4 = scmp.lt.s32.totalorder %s2005_s28, %s2578_s0 }
  0x19   : > { %p1791_p2 = pnand %p1790_p1, %p1789_p0  ;;  %p1795_p5 = scmp.lt.s32.totalorder %s1793_s25, %s1788_s18 }
  0x1b   : > { %p1792_p3 = pneg %p1791_p2  ;;  %p1796_p7 = por %p1795_p5, %p1794_p4 }
  0x1d   : > { %p1797_p8 = pnand %p1796_p7, %p1792_p3 }
  0x1f   : > { %1800 = shalt.err (!%p1797_p8)
}
  0x20   : > { %s1801_s23 = scalar_lea.vmem %s2013_s14, 512  ;;  %s1882_s29 = smov [#allocation3]  }
  0x21   : > { %p1802_p10 = scmp.ne.s32.totalorder %s2013_s14, %s1801_s23  ;;  %s1806_s11 = sshll.u32 %s1882_s29, 4  ;;  %s1807_s11 = int_to_ptr.vmem [resolvable:$false] %s1806_s11 }
  0x22   : > { %s1808_s24 = scalar_lea.vmem %s1807_s11, 1024  ;;  %p1809_p2 = scmp.lt.s32.totalorder %s2013_s14, %s1807_s11 }
  0x23   : > { %p1804_p9 = pnand %p1802_p10, %p1790_p1  ;;  %p1810_p12 = scmp.lt.s32.totalorder %s1808_s24, %s1801_s23 }
  0x25   : > { %p1805_p0 = pneg %p1804_p9  ;;  %p1811_p11 = por %p1810_p12, %p1809_p2 }
  0x27   : > { %p1812_p6 = pnand %p1811_p11, %p1805_p0 }
  0x29   : > { %1815 = shalt.err (!%p1812_p6)
}
  0x2a   : > { %s1883_s18 = smov 256   ;;  %s1884_s26 = smov 16  }
  0x2b   : > { %1733 = dma.hbm_to_vmem [thread:$0]  (!%p2009_p13), %s2005_s28, 512, %s2013_s14, %s2015_s17, %s1883_s18, %s1883_s18, %s1884_s26  }
  0x2c   : > { %p1690_p9 = scmp.ge.s32.totalorder %s1880_s12, 1  ;;  %p307_p1 = scmp.lt.s32.totalorder %s1880_s12, 3 }
  0x2e   : > { %p308_p3 = pnand %p1690_p9, %p307_p1 }
  0x2f   : > { %s2039_s11 = sand.u32 (!%p308_p3), 1, %s1872_s10   ;;  %p2598_p6 = scmp.ne.s32.totalorder (!%p308_p3), %s2594_s20, 0 }
  0x30   : > { %311 = sbr.rel (%p308_p3) target bundleno = 1190 (0x4a6), region = 56  ;;  %s1691_s25 = sshll.u32 (!%p308_p3), %s2039_s11, 5 }
  0x31   : > { %s314_s19 = scalar_lea.sflag (!%p308_p3), [#allocation4], %s2039_s11  ;;  %s2045_s27 = scalar_lea.vmem (!%p308_p3), [#allocation3], %s1691_s25 }
  0x35   : > { %1859 = dma.done.wait (%p2598_p6), %s314_s19, 512  }
  0x36   : > { %1861 = vsyncadd (%p2598_p6), %s314_s19, 4294966784  ;;  %v1693_v0 = vld [vmem:[%s2045_s27 + $0x10] sm:$0xff]  ;;  %v355_v1 = vld [vmem:[%s2045_s27] sm:$0xff]  ;;  %s1885_s28 = smov 15   ;;  %vm596_vm0 = vcmask 1043456   ;;  %s1886_s20 = smov 1   ;;  %v368_v13 = vlaneseq }
  0x37   : > { %v1694_v2 = vld [vmem:[%s2045_s27 + $0x18] sm:$0xff]  ;;  %453 = vrot.lane.b32.xlu1 %v1693_v0, %s1885_s28  ;;  %449 = vrot.lane.b32.xlu0 %v355_v1, %s1885_s28  ;;  %v571_v3 = vpack.c.bf16 %v355_v1, %v355_v1  ;;  %v573_v5 = vpack.c.bf16 %v1693_v0, %v1693_v0  ;;  %v356_v6 = vld [vmem:[%s2045_s27 + $0x8] sm:$0xff]  ;;  %s1887_s14 = smov 17   ;;  %v1888_v10 = vmov 0   ;;  %s1889_s16 = smov 16   ;;  %vm592_vm5 = vcmask 326656  }
  0x38   : > { %v574_v4 = vpack.c.bf16 %v1694_v2, %v1694_v2  ;;  %v572_v7 = vpack.c.bf16 %v356_v6, %v356_v6  ;;  %641 = vmatprep.mubr.bf16.mxu0 %v1888_v10  ;;  %684 = vmatprep.mubr.bf16.mxu1 %v1888_v10  ;;  %v575_v11 = vld [vmem:[%s2581_s3] sm:$0xff]  ;;  %v576_v12 = vld [vmem:[%s2581_s3 + $0x8] sm:$0xff]  ;;  %v378_v14 = vshrl.u32 %v368_v13, 7  ;;  %v2081_v17 = vand.u32 127, %v368_v13  ;;  %s1725_s24 = sshll.u32 %s1963_s13, 9  ;;  %s1596_s18 = scalar_lea.sflag [#allocation5], %s2039_s11 }
  0x39   : > { %v598_v8 = vsel %vm596_vm0, %v571_v3, 0  ;;  %v604_v9 = vsel %vm596_vm0, %v573_v5, 0  ;;  %1780 = vset.pattern.permute.xlu0 %v1888_v10  ;;  %1781 = vset.pattern.permute.xlu1 %v1888_v10  ;;  %v1696_v19 = vld [vmem:[%s2579_s1 + $0x2] ss:$8 sm:$0xf]  ;;  %vm1054_vm14 = vcmask 654336  }
  0x3a   : > { %1701 = vmatprep.subr.msk.bf16.mxu1 %vm596_vm0, %v574_v4  ;;  %1699 = vmatprep.subr.msk.bf16.mxu0 %vm596_vm0, %v572_v7  ;;  %v2083_v18 = vsub.s32 1, %v378_v14  ;;  %v1697_v20 = vld [vmem:[%s2579_s1 + $0x3] ss:$8 sm:$0xf]  ;;  %v2091_v21 = vsub.s32 0, %v378_v14  ;;  %v2093_v22 = vsub.s32 3, %v378_v14 }
  0x3b   : > { %455 = vrot.lane.b32.xlu1 %v1694_v2, %s1885_s28  ;;  %451 = vrot.lane.b32.xlu0 %v356_v6, %s1885_s28  ;;  %vm457_vm1 = vcmp.lt.s32.totalorder %v2081_v17, 15  ;;  %v2096_v24 = vsub.s32 2, %v378_v14  ;;  %vm501_vm2 = vcmp.lt.s32.totalorder %v2081_v17, 1  ;;  %v375_v60 = vld [vmem:[%s2579_s1] ss:$8 sm:$0xf] }
  0x3c   : > { %663 = vmatpush1.bf16.msra.mxu1 %v604_v9  ;;  %620 = vmatpush1.bf16.msra.mxu0 %v598_v8  ;;  %v472_v26 = vrot.slane %v1696_v19, %v2083_v18  ;;  %v516_v27 = vrot.slane %v1697_v20, %v2083_v18  ;;  %v468_v29 = vrot.slane %v1696_v19, %v2091_v21  ;;  %v1695_v61 = vld [vmem:[%s2579_s1 + $0x1] ss:$8 sm:$0xf]  ;;  %vm370_vm3 = vcmp.lt.s32.totalorder %v2081_v17, 17  ;;  %p2599_p12 = scmp.ne.s32.totalorder %s2595_s21, 0  ;;  %s1890_s19 = smov [#allocation6]  }
  0x3d   : > { %v480_v30 = vrot.slane %v1696_v19, %v2093_v22  ;;  %v476_v31 = vrot.slane %v1696_v19, %v2096_v24  ;;  %v512_v36 = vrot.slane %v1697_v20, %v2091_v21  ;;  %v520_v37 = vrot.slane %v1697_v20, %v2096_v24 }
  0x3e   : > { %v524_v41 = vrot.slane %v1697_v20, %v2093_v22  ;;  %vm413_vm4 = vcmp.lt.s32.totalorder %v2081_v17, 16  ;;  %v380_v3 = vrot.slane %v375_v60, %v2091_v21  ;;  %v388_v4 = vrot.slane %v375_v60, %v2096_v24 }
  0x3f   : > { %495 = vrot.lane.b32.xlu1 %v356_v6, %s1886_s20  ;;  %493 = vrot.lane.b32.xlu0 %v355_v1, %s1886_s20  ;;  %v392_v5 = vrot.slane %v375_v60, %v2093_v22 }
  0x43   : > { %499 = vrot.lane.b32.xlu1 %v1694_v2, %s1886_s20  ;;  %497 = vrot.lane.b32.xlu0 %v1693_v0, %s1886_s20 }
  0x47   : > { %362 = vrot.lane.b32.xlu1 %v356_v6, %s1887_s14  ;;  %360 = vrot.lane.b32.xlu0 %v355_v1, %s1887_s14 }
  0x4b   : > { %366 = vrot.lane.b32.xlu1 %v1694_v2, %s1887_s14  ;;  %364 = vrot.lane.b32.xlu0 %v1693_v0, %s1887_s14 }
  0x4f   : > { %407 = vrot.lane.b32.xlu1 %v356_v6, %s1889_s16  ;;  %405 = vrot.lane.b32.xlu0 %v355_v1, %s1889_s16  ;;  %v428_v1 = vrot.slane %v1695_v61, %v2083_v18 }
  0x53   : > { %411 = vrot.lane.b32.xlu1 %v1694_v2, %s1889_s16  ;;  %409 = vrot.lane.b32.xlu0 %v1693_v0, %s1889_s16  ;;  %v384_v0 = vrot.slane %v375_v60, %v2083_v18 }
  0x57   : > { %579 = vperm.xlu0 %1780, %v575_v11   ;;  %584 = vperm.xlu1 %1781, %v576_v12   ;;  %v424_v11 = vrot.slane %v1695_v61, %v2091_v21  ;;  %v432_v12 = vrot.slane %v1695_v61, %v2096_v24 }
  0xa9   : > { %v454_v15 = vpop.permute.xlu1 %453  ;;  %v450_v16 = vpop.permute.xlu0 %449 }
  0xad   : > { %v456_v23 = vpop.permute.xlu1 %455  ;;  %v452_v25 = vpop.permute.xlu0 %451 }
  0xae   : > { %v460_v28 = vsel %vm457_vm1, %v450_v16, %v452_v25  ;;  %v461_v34 = vsel %vm457_vm1, %v456_v23, %v450_v16  ;;  %v458_v38 = vsel %vm457_vm1, %v454_v15, %v456_v23  ;;  %v459_v42 = vsel %vm457_vm1, %v452_v25, %v454_v15 }
  0xaf   : > { %v486_v39 = vmul.f32 %v472_v26, %v460_v28  ;;  %v485_v43 = vmul.f32 %v468_v29, %v461_v34  ;;  %v488_v47 = vmul.f32 %v480_v30, %v458_v38  ;;  %v487_v51 = vmul.f32 %v476_v31, %v459_v42  ;;  %v1782_v38 = vld [vmem:[%s2580_s2] sm:$0xff]  }
  0xb0   : > { %v436_v16 = vrot.slane %v1695_v61, %v2093_v22 }
  0xb1   : > { %v496_v32 = vpop.permute.xlu1 %495  ;;  %v494_v33 = vpop.permute.xlu0 %493 }
  0xb2   : > { %v504_v35 = vsel %vm501_vm2, %v494_v33, %v496_v32 }
  0xb3   : > { %v530_v40 = vmul.f32 %v516_v27, %v504_v35 }
  0xb5   : > { %v500_v44 = vpop.permute.xlu1 %499  ;;  %v498_v45 = vpop.permute.xlu0 %497  ;;  %v568_v46 = vpack.c.bf16 %v530_v40, %v486_v39 }
  0xb6   : > { %v505_v48 = vsel %vm501_vm2, %v500_v44, %v494_v33  ;;  %v502_v49 = vsel %vm501_vm2, %v498_v45, %v500_v44  ;;  %v503_v50 = vsel %vm501_vm2, %v496_v32, %v498_v45 }
  0xb7   : > { %v529_v52 = vmul.f32 %v512_v36, %v505_v48  ;;  %v531_v53 = vmul.f32 %v520_v37, %v503_v50  ;;  %v532_v54 = vmul.f32 %v524_v41, %v502_v49  ;;  %621 = vmatprep.subr.bf16.mxu0 %v568_v46 }
  0xb9   : > { %v363_v55 = vpop.permute.xlu1 %362  ;;  %v361_v56 = vpop.permute.xlu0 %360  ;;  %v567_v57 = vpack.c.bf16 %v529_v52, %v485_v43  ;;  %v570_v58 = vpack.c.bf16 %v532_v54, %v488_v47  ;;  %v569_v59 = vpack.c.bf16 %v531_v53, %v487_v51 }
  0xba   : > { %v373_v2 = vsel %vm370_vm3, %v361_v56, %v363_v55 }
  0xbb   : > { %622 = vmatpush1.bf16.msra.mxu0 %v567_v57  ;;  %664 = vmatprep.subr.bf16.mxu1 %v570_v58  ;;  %v398_v13 = vmul.f32 %v384_v0, %v373_v2 }
  0xbc   : > { %665 = vmatpush1.bf16.msra.mxu1 %v569_v59 }
  0xbd   : > { %v367_v62 = vpop.permute.xlu1 %366  ;;  %v365_v63 = vpop.permute.xlu0 %364 }
  0xbe   : > { %v374_v8 = vsel %vm370_vm3, %v367_v62, %v361_v56  ;;  %v372_v14 = vsel %vm370_vm3, %v363_v55, %v365_v63  ;;  %v371_v19 = vsel %vm370_vm3, %v365_v63, %v367_v62 }
  0xbf   : > { %v397_v20 = vmul.f32 %v380_v3, %v374_v8  ;;  %v399_v27 = vmul.f32 %v388_v4, %v372_v14  ;;  %v400_v31 = vmul.f32 %v392_v5, %v371_v19  ;;  %v1037_v14 = vld [vmem:[%s2583_s5] sm:$0xff] }
  0xc1   : > { %v408_v6 = vpop.permute.xlu1 %407  ;;  %v406_v7 = vpop.permute.xlu0 %405 }
  0xc2   : > { %v416_v9 = vsel %vm413_vm4, %v406_v7, %v408_v6 }
  0xc3   : > { %v442_v15 = vmul.f32 %v428_v1, %v416_v9 }
  0xc5   : > { %v412_v23 = vpop.permute.xlu1 %411  ;;  %v410_v25 = vpop.permute.xlu0 %409  ;;  %v564_v26 = vpack.c.bf16 %v442_v15, %v398_v13  ;;  %v1038_v15 = vld [vmem:[%s2583_s5 + $0x8] sm:$0xff] }
  0xc6   : > { %v417_v28 = vsel %vm413_vm4, %v412_v23, %v406_v7  ;;  %v414_v29 = vsel %vm413_vm4, %v410_v25, %v412_v23  ;;  %v415_v30 = vsel %vm413_vm4, %v408_v6, %v410_v25 }
  0xc7   : > { %v441_v32 = vmul.f32 %v424_v11, %v417_v28  ;;  %v443_v33 = vmul.f32 %v432_v12, %v415_v30  ;;  %v444_v34 = vmul.f32 %v436_v16, %v414_v29  ;;  %623 = vmatprep.subr.bf16.mxu0 %v564_v26 }
  0xc9   : > { %v563_v35 = vpack.c.bf16 %v441_v32, %v397_v20  ;;  %v566_v36 = vpack.c.bf16 %v444_v34, %v400_v31  ;;  %v565_v37 = vpack.c.bf16 %v443_v33, %v399_v27 }
  0xcb   : > { %624 = vmatpush1.bf16.msra.mxu0 %v563_v35  ;;  %666 = vmatprep.subr.bf16.mxu1 %v566_v36  ;;  %v1705_v36 = vld [vmem:[%s2579_s1 + $0x3] ss:$8 sm:$0xf] }
  0xcc   : > { %667 = vmatpush1.bf16.msra.mxu1 %v565_v37 }
  0xce   : > { %1700 = vmatmul.mubr.msk.bf16.vlgmr.msra.gmra.mxu0 %vm592_vm5, %v1782_v38 }
  0xcf   : > { %1702 = vmatmul.mubr.msk.bf16.vlgmr.msra.gmra.mxu1 %vm592_vm5, %v1782_v38  ;;  %1090 = vmatprep.mubr.bf16.mxu0 %v1888_v10 }
  0xd0   : > { %1133 = vmatprep.mubr.bf16.mxu1 %v1888_v10 }
  0xd2   : > { %v580_v39 = vpop.permute.xlu0 %579  ;;  %v585_v45 = vpop.permute.xlu1 %584 }
 0x18e   : > { %v643_v40 = vpop.f32.mrf.mxu0 }
 0x18f   : > { %v644_v41 = vadd.f32 %v643_v40, %v580_v39  ;;  %v686_v42 = vpop.f32.mrf.mxu1 }
 0x190   : > { %v687_v43 = vadd.f32 %v686_v42, %v580_v39  ;;  %v645_v44 = vpop.f32.mrf.mxu0 }
 0x191   : > { %vm695_vm6 = vcmp.ge.f32.partialorder %v644_v41, 0.0  ;;  %v703_v46 = vmul.f32 0.01, %v644_v41  ;;  %v646_v47 = vadd.f32 %v645_v44, %v580_v39  ;;  %v688_v48 = vpop.f32.mrf.mxu1 }
 0x192   : > { %vm697_vm7 = vcmp.ge.f32.partialorder %v687_v43, 0.0  ;;  %v705_v49 = vmul.f32 0.01, %v687_v43  ;;  %v689_v50 = vadd.f32 %v688_v48, %v580_v39  ;;  %v647_v51 = vpop.f32.mrf.mxu0  ;;  %v938_v39 = vrot.slane %v1705_v36, %v2083_v18 }
 0x193   : > { %v711_v52 = vsel %vm695_vm6, %v644_v41, %v703_v46  ;;  %v648_v53 = vadd.f32 %v647_v51, %v585_v45  ;;  %v690_v54 = vpop.f32.mrf.mxu1  ;;  %vm696_vm8 = vcmp.ge.f32.partialorder %v646_v47, 0.0  ;;  %v704_v55 = vmul.f32 0.01, %v646_v47 }
 0x194   : > { %v691_v56 = vadd.f32 %v690_v54, %v585_v45  ;;  %v649_v57 = vpop.f32.mrf.mxu0  ;;  %905 = vrot.lane.b32.xlu1 %v711_v52, %s1886_s20  ;;  %v713_v58 = vsel %vm697_vm7, %v687_v43, %v705_v49  ;;  %vm698_vm10 = vcmp.ge.f32.partialorder %v689_v50, 0.0  ;;  %v706_v62 = vmul.f32 0.01, %v689_v50 }
 0x195   : > { %vm699_vm9 = vcmp.ge.f32.partialorder %v648_v53, 0.0  ;;  %v707_v59 = vmul.f32 0.01, %v648_v53  ;;  %v650_v60 = vadd.f32 %v649_v57, %v585_v45  ;;  %v692_v61 = vpop.f32.mrf.mxu1  ;;  %v712_v4 = vsel %vm696_vm8, %v646_v47, %v704_v55 }
 0x196   : > { %v709_v63 = vmul.f32 0.01, %v691_v56  ;;  %v693_v0 = vadd.f32 %v692_v61, %v585_v45  ;;  %vm701_vm11 = vcmp.ge.f32.partialorder %v691_v56, 0.0  ;;  %v714_v6 = vsel %vm698_vm10, %v689_v50, %v706_v62  ;;  %v1704_v45 = vld [vmem:[%s2579_s1 + $0x2] ss:$8 sm:$0xf] }
 0x197   : > { %v715_v1 = vsel %vm699_vm9, %v648_v53, %v707_v59  ;;  %vm700_vm12 = vcmp.ge.f32.partialorder %v650_v60, 0.0  ;;  %v708_v2 = vmul.f32 0.01, %v650_v60  ;;  %v934_v43 = vrot.slane %v1705_v36, %v2091_v21 }
 0x198   : > { %vm702_vm13 = vcmp.ge.f32.partialorder %v693_v0, 0.0  ;;  %v710_v3 = vmul.f32 0.01, %v693_v0  ;;  %907 = vrot.lane.b32.xlu0 %v715_v1, %s1886_s20  ;;  %913 = vrot.lane.b32.xlu1 %v713_v58, %s1886_s20  ;;  %v717_v7 = vsel %vm701_vm11, %v691_v56, %v709_v63  ;;  %v1033_v11 = vpack.c.bf16 %v715_v1, %v711_v52 }
 0x199   : > { %v716_v5 = vsel %vm700_vm12, %v650_v60, %v708_v2  ;;  %v1035_v13 = vpack.c.bf16 %v717_v7, %v713_v58  ;;  %v946_v49 = vrot.slane %v1705_v36, %v2093_v22  ;;  %v942_v50 = vrot.slane %v1705_v36, %v2096_v24 }
 0x19a   : > { %v718_v8 = vsel %vm702_vm13, %v693_v0, %v710_v3  ;;  %v1034_v9 = vpack.c.bf16 %v716_v5, %v712_v4  ;;  %v876_v54 = vrot.slane %v1704_v45, %v2083_v18 }
 0x19b   : > { %v1036_v12 = vpack.c.bf16 %v718_v8, %v714_v6 }
 0x19c   : > { %915 = vrot.lane.b32.xlu0 %v717_v7, %s1886_s20  ;;  %1064 = vmatprep.subr.bf16.mxu0 %v1034_v9 }
 0x19d   : > { %843 = vrot.lane.b32.xlu1 %v711_v52, %s1885_s28  ;;  %1065 = vmatpush1.bf16.msra.mxu0 %v1033_v11  ;;  %v1703_v11 = vld [vmem:[%s2579_s1 + $0x1] ss:$8 sm:$0xf] }
 0x19e   : > { %1107 = vmatprep.subr.bf16.mxu1 %v1036_v12  ;;  %v814_v36 = vrot.slane %v1703_v11, %v2083_v18 }
 0x19f   : > { %1108 = vmatpush1.bf16.msra.mxu1 %v1035_v13 }
 0x1a0   : > { %845 = vrot.lane.b32.xlu0 %v715_v1, %s1885_s28 }
 0x1a1   : > { %851 = vrot.lane.b32.xlu1 %v713_v58, %s1885_s28 }
 0x1a4   : > { %853 = vrot.lane.b32.xlu0 %v717_v7, %s1885_s28 }
 0x1a5   : > { %781 = vrot.lane.b32.xlu1 %v711_v52, %s1889_s16 }
 0x1a8   : > { %783 = vrot.lane.b32.xlu0 %v715_v1, %s1889_s16 }
 0x1a9   : > { %789 = vrot.lane.b32.xlu1 %v713_v58, %s1889_s16 }
 0x1ac   : > { %791 = vrot.lane.b32.xlu0 %v717_v7, %s1889_s16 }
 0x1ad   : > { %719 = vrot.lane.b32.xlu1 %v711_v52, %s1887_s14 }
 0x1b0   : > { %721 = vrot.lane.b32.xlu0 %v715_v1, %s1887_s14 }
 0x1b1   : > { %727 = vrot.lane.b32.xlu1 %v713_v58, %s1887_s14 }
 0x1b4   : > { %729 = vrot.lane.b32.xlu0 %v717_v7, %s1887_s14  ;;  %v872_v7 = vrot.slane %v1704_v45, %v2091_v21 }
 0x1b5   : > { %909 = vrot.lane.b32.xlu1 %v712_v4, %s1886_s20 }
 0x1b8   : > { %911 = vrot.lane.b32.xlu0 %v716_v5, %s1886_s20 }
 0x1b9   : > { %917 = vrot.lane.b32.xlu1 %v714_v6, %s1886_s20 }
 0x1bc   : > { %919 = vrot.lane.b32.xlu0 %v718_v8, %s1886_s20 }
 0x1bd   : > { %847 = vrot.lane.b32.xlu1 %v712_v4, %s1885_s28 }
 0x1c0   : > { %849 = vrot.lane.b32.xlu0 %v716_v5, %s1885_s28 }
 0x1c1   : > { %855 = vrot.lane.b32.xlu1 %v714_v6, %s1885_s28 }
 0x1c4   : > { %857 = vrot.lane.b32.xlu0 %v718_v8, %s1885_s28 }
 0x1c5   : > { %785 = vrot.lane.b32.xlu1 %v712_v4, %s1889_s16 }
 0x1c8   : > { %787 = vrot.lane.b32.xlu0 %v716_v5, %s1889_s16 }
 0x1c9   : > { %793 = vrot.lane.b32.xlu1 %v714_v6, %s1889_s16 }
 0x1cc   : > { %795 = vrot.lane.b32.xlu0 %v718_v8, %s1889_s16 }
 0x1cd   : > { %723 = vrot.lane.b32.xlu1 %v712_v4, %s1887_s14 }
 0x1d0   : > { %725 = vrot.lane.b32.xlu0 %v716_v5, %s1887_s14 }
 0x1d1   : > { %731 = vrot.lane.b32.xlu1 %v714_v6, %s1887_s14 }
 0x1d4   : > { %733 = vrot.lane.b32.xlu0 %v718_v8, %s1887_s14  ;;  %v884_v8 = vrot.slane %v1704_v45, %v2093_v22 }
 0x1d5   : > { %1041 = vperm.xlu1 %1781, %v1037_v14  }
 0x1d8   : > { %1046 = vperm.xlu0 %1780, %v1038_v15  }
 0x206   : > { %v906_v16 = vpop.permute.xlu1 %905 }
 0x20a   : > { %v908_v19 = vpop.permute.xlu0 %907  ;;  %v914_v20 = vpop.permute.xlu1 %913 }
 0x20e   : > { %v916_v23 = vpop.permute.xlu0 %915 }
 0x20f   : > { %v844_v25 = vpop.permute.xlu1 %843 }
 0x212   : > { %v2199_v26 = vpop.permute.xlu0 %845 }
 0x213   : > { %v2201_v27 = vpop.permute.xlu1 %851 }
 0x216   : > { %v2203_v28 = vpop.permute.xlu0 %853 }
 0x217   : > { %v2205_v29 = vpop.permute.xlu1 %781 }
 0x21a   : > { %v2207_v30 = vpop.permute.xlu0 %783 }
 0x21b   : > { %v2209_v31 = vpop.permute.xlu1 %789 }
 0x21e   : > { %v2211_v32 = vpop.permute.xlu0 %791 }
 0x21f   : > { %v2213_v33 = vpop.permute.xlu1 %719 }
 0x222   : > { %v2215_v34 = vpop.permute.xlu0 %721 }
 0x223   : > { %v2217_v35 = vpop.permute.xlu1 %727 }
 0x226   : > { %v2222_v37 = vpop.permute.xlu0 %729 }
 0x227   : > { %v910_v38 = vpop.permute.xlu1 %909 }
 0x228   : > { %v925_v40 = vsel %vm501_vm2, %v906_v16, %v910_v38  ;;  %v923_v56 = vsel %vm501_vm2, %v910_v38, %v914_v20 }
 0x229   : > { %v952_v46 = vmul.f32 %v938_v39, %v925_v40  ;;  %v953_v2 = vmul.f32 %v942_v50, %v923_v56 }
 0x22a   : > { %v912_v41 = vpop.permute.xlu0 %911 }
 0x22b   : > { %v926_v42 = vsel %vm501_vm2, %v908_v19, %v912_v41  ;;  %v918_v44 = vpop.permute.xlu1 %917  ;;  %v924_v47 = vsel %vm501_vm2, %v912_v41, %v916_v23 }
 0x22c   : > { %v956_v48 = vmul.f32 %v938_v39, %v926_v42  ;;  %v921_v51 = vsel %vm501_vm2, %v914_v20, %v918_v44  ;;  %v927_v52 = vsel %vm501_vm2, %v918_v44, %v906_v16  ;;  %v957_v57 = vmul.f32 %v942_v50, %v924_v47 }
 0x22d   : > { %v951_v61 = vmul.f32 %v934_v43, %v927_v52  ;;  %v954_v62 = vmul.f32 %v946_v49, %v921_v51  ;;  %v880_v16 = vrot.slane %v1704_v45, %v2096_v24  ;;  %v822_v51 = vrot.slane %v1703_v11, %v2093_v22 }
 0x22e   : > { %v920_v53 = vpop.permute.xlu0 %919  ;;  %v1030_v55 = vpack.c.bf16 %v956_v48, %v952_v46  ;;  %v1031_v12 = vpack.c.bf16 %v957_v57, %v953_v2 }
 0x22f   : > { %v922_v58 = vsel %vm501_vm2, %v916_v23, %v920_v53  ;;  %v928_v59 = vsel %vm501_vm2, %v920_v53, %v908_v19  ;;  %v848_v60 = vpop.permute.xlu1 %847  ;;  %v743_v53 = vld [vmem:[%s2579_s1] ss:$8 sm:$0xf] }
 0x230   : > { %v955_v63 = vmul.f32 %v934_v43, %v928_v59  ;;  %v958_v0 = vmul.f32 %v946_v49, %v922_v58  ;;  %1066 = vmatprep.subr.bf16.mxu0 %v1030_v55  ;;  %v863_v1 = vsel %vm457_vm1, %v844_v25, %v848_v60  ;;  %v861_v39 = vsel %vm457_vm1, %v848_v60, %v2201_v27 }
 0x231   : > { %v890_v13 = vmul.f32 %v876_v54, %v863_v1  ;;  %v818_v58 = vrot.slane %v1703_v11, %v2096_v24 }
 0x232   : > { %v1029_v3 = vpack.c.bf16 %v955_v63, %v951_v61  ;;  %v850_v4 = vpop.permute.xlu0 %849  ;;  %v1032_v5 = vpack.c.bf16 %v958_v0, %v954_v62  ;;  %v752_v62 = vrot.slane %v743_v53, %v2083_v18 }
 0x233   : > { %v864_v6 = vsel %vm457_vm1, %v2199_v26, %v850_v4  ;;  %v856_v9 = vpop.permute.xlu1 %855  ;;  %v862_v14 = vsel %vm457_vm1, %v850_v4, %v2203_v28 }
 0x234   : > { %v894_v15 = vmul.f32 %v876_v54, %v864_v6  ;;  %1067 = vmatpush1.bf16.msra.mxu0 %v1029_v3  ;;  %v859_v19 = vsel %vm457_vm1, %v2201_v27, %v856_v9  ;;  %v865_v20 = vsel %vm457_vm1, %v856_v9, %v844_v25  ;;  %1109 = vmatprep.subr.bf16.mxu1 %v1032_v5 }
 0x235   : > { %1110 = vmatpush1.bf16.msra.mxu1 %v1031_v12  ;;  %v895_v40 = vmul.f32 %v880_v16, %v862_v14  ;;  %v889_v43 = vmul.f32 %v872_v7, %v865_v20  ;;  %v892_v44 = vmul.f32 %v884_v8, %v859_v19  ;;  %v891_v27 = vmul.f32 %v880_v16, %v861_v39 }
 0x236   : > { %v858_v23 = vpop.permute.xlu0 %857  ;;  %v1026_v38 = vpack.c.bf16 %v894_v15, %v890_v13  ;;  %v760_v13 = vrot.slane %v743_v53, %v2093_v22 }
 0x237   : > { %v860_v41 = vsel %vm457_vm1, %v2203_v28, %v858_v23  ;;  %v866_v42 = vsel %vm457_vm1, %v858_v23, %v2199_v26  ;;  %v786_v25 = vpop.permute.xlu1 %785  ;;  %v810_v26 = vrot.slane %v1703_v11, %v2091_v21  ;;  %v1027_v54 = vpack.c.bf16 %v895_v40, %v891_v27 }
 0x238   : > { %v893_v45 = vmul.f32 %v872_v7, %v866_v42  ;;  %v896_v46 = vmul.f32 %v884_v8, %v860_v41  ;;  %1068 = vmatprep.subr.bf16.mxu0 %v1026_v38  ;;  %v801_v47 = vsel %vm413_vm4, %v2205_v29, %v786_v25  ;;  %v799_v0 = vsel %vm413_vm4, %v786_v25, %v2209_v31 }
 0x239   : > { %v828_v55 = vmul.f32 %v814_v36, %v801_v47  ;;  %v756_v23 = vrot.slane %v743_v53, %v2096_v24 }
 0x23a   : > { %v1025_v48 = vpack.c.bf16 %v893_v45, %v889_v43  ;;  %v788_v49 = vpop.permute.xlu0 %787  ;;  %v1028_v50 = vpack.c.bf16 %v896_v46, %v892_v44 }
 0x23b   : > { %v802_v28 = vsel %vm413_vm4, %v2207_v30, %v788_v49  ;;  %v794_v52 = vpop.permute.xlu1 %793  ;;  %v800_v56 = vsel %vm413_vm4, %v788_v49, %v2211_v32  ;;  %v1783_v49 = vld [vmem:[%s2582_s4] sm:$0xff]  }
 0x23c   : > { %v832_v57 = vmul.f32 %v814_v36, %v802_v28  ;;  %1069 = vmatpush1.bf16.msra.mxu0 %v1025_v48  ;;  %v797_v59 = vsel %vm413_vm4, %v2209_v31, %v794_v52  ;;  %v803_v60 = vsel %vm413_vm4, %v794_v52, %v2205_v29  ;;  %1111 = vmatprep.subr.bf16.mxu1 %v1028_v50 }
 0x23d   : > { %1112 = vmatpush1.bf16.msra.mxu1 %v1027_v54  ;;  %v833_v1 = vmul.f32 %v818_v58, %v800_v56  ;;  %v827_v4 = vmul.f32 %v810_v26, %v803_v60  ;;  %v830_v5 = vmul.f32 %v822_v51, %v797_v59  ;;  %v829_v31 = vmul.f32 %v818_v58, %v799_v0 }
 0x23e   : > { %v796_v61 = vpop.permute.xlu0 %795  ;;  %v1022_v63 = vpack.c.bf16 %v832_v57, %v828_v55 }
 0x23f   : > { %v798_v2 = vsel %vm413_vm4, %v2211_v32, %v796_v61  ;;  %v804_v3 = vsel %vm413_vm4, %v796_v61, %v2207_v30  ;;  %v724_v29 = vpop.permute.xlu1 %723  ;;  %v748_v30 = vrot.slane %v743_v53, %v2091_v21  ;;  %v1023_v15 = vpack.c.bf16 %v833_v1, %v829_v31 }
 0x240   : > { %v831_v6 = vmul.f32 %v810_v26, %v804_v3  ;;  %v834_v7 = vmul.f32 %v822_v51, %v798_v2  ;;  %1070 = vmatprep.subr.bf16.mxu0 %v1022_v63  ;;  %v739_v8 = vsel %vm370_vm3, %v2213_v33, %v724_v29  ;;  %v737_v39 = vsel %vm370_vm3, %v724_v29, %v2217_v35 }
 0x241   : > { %v766_v16 = vmul.f32 %v752_v62, %v739_v8  ;;  %v767_v47 = vmul.f32 %v756_v23, %v737_v39 }
 0x242   : > { %v1021_v9 = vpack.c.bf16 %v831_v6, %v827_v4  ;;  %v726_v11 = vpop.permute.xlu0 %725  ;;  %v1024_v12 = vpack.c.bf16 %v834_v7, %v830_v5 }
 0x243   : > { %v740_v32 = vsel %vm370_vm3, %v2215_v34, %v726_v11  ;;  %v732_v14 = vpop.permute.xlu1 %731  ;;  %v738_v19 = vsel %vm370_vm3, %v726_v11, %v2222_v37 }
 0x244   : > { %v770_v20 = vmul.f32 %v752_v62, %v740_v32  ;;  %1071 = vmatpush1.bf16.msra.mxu0 %v1021_v9  ;;  %v735_v36 = vsel %vm370_vm3, %v2217_v35, %v732_v14  ;;  %v741_v38 = vsel %vm370_vm3, %v732_v14, %v2213_v33  ;;  %1113 = vmatprep.subr.bf16.mxu1 %v1024_v12 }
 0x245   : > { %1114 = vmatpush1.bf16.msra.mxu1 %v1023_v15  ;;  %v771_v42 = vmul.f32 %v756_v23, %v738_v19  ;;  %v765_v44 = vmul.f32 %v748_v30, %v741_v38  ;;  %v768_v45 = vmul.f32 %v760_v13, %v735_v36  ;;  %v1576_v19 = vld [vmem:[%s2586_s8] sm:$0xff] }
 0x246   : > { %v734_v40 = vpop.permute.xlu0 %733  ;;  %v1018_v41 = vpack.c.bf16 %v770_v20, %v766_v16  ;;  %v1485_v16 = vld [vmem:[%s2585_s7] sm:$0xff] }
 0x247   : > { %v736_v25 = vsel %vm370_vm3, %v2222_v37, %v734_v40  ;;  %v742_v43 = vsel %vm370_vm3, %v734_v40, %v2215_v34  ;;  %v1019_v48 = vpack.c.bf16 %v771_v42, %v767_v47 }
 0x248   : > { %v769_v33 = vmul.f32 %v748_v30, %v742_v43  ;;  %v772_v46 = vmul.f32 %v760_v13, %v736_v25  ;;  %1072 = vmatprep.subr.bf16.mxu0 %v1018_v41 }
 0x24a   : > { %v1017_v27 = vpack.c.bf16 %v769_v33, %v765_v44  ;;  %v1020_v35 = vpack.c.bf16 %v772_v46, %v768_v45 }
 0x24c   : > { %1073 = vmatpush1.bf16.msra.mxu0 %v1017_v27  ;;  %1115 = vmatprep.subr.bf16.mxu1 %v1020_v35  ;;  %v1711_v27 = vld [vmem:[%s2579_s1 + $0x3] ss:$8 sm:$0xf] }
 0x24d   : > { %1116 = vmatpush1.bf16.msra.mxu1 %v1019_v48 }
 0x24f   : > { %1707 = vmatmul.mubr.msk.bf16.vlgmr.msra.gmra.mxu0 %vm1054_vm14, %v1783_v49 }
 0x250   : > { %1708 = vmatmul.mubr.msk.bf16.vlgmr.msra.gmra.mxu1 %vm1054_vm14, %v1783_v49  ;;  %1526 = vmatprep.mubr.bf16.mxu0 %v1888_v10  ;;  %v1042_v34 = vpop.permute.xlu1 %1041  ;;  %v1387_v49 = vrot.slane %v1711_v27, %v2083_v18 }
 0x251   : > { %1567 = vmatprep.mubr.bf16.mxu1 %v1888_v10 }
 0x253   : > { %v1047_v55 = vpop.permute.xlu0 %1046 }
 0x30f   : > { %v1092_v37 = vpop.f32.mrf.mxu0 }
 0x310   : > { %v1093_v50 = vadd.f32 %v1092_v37, %v1042_v34  ;;  %v1135_v28 = vpop.f32.mrf.mxu1 }
 0x311   : > { %v1136_v26 = vadd.f32 %v1135_v28, %v1042_v34  ;;  %v1094_v51 = vpop.f32.mrf.mxu0  ;;  %v1383_v28 = vrot.slane %v1711_v27, %v2091_v21 }
 0x312   : > { %vm1144_vm15 = vcmp.ge.f32.partialorder %v1093_v50, 0.0  ;;  %v1152_v52 = vmul.f32 0.01, %v1093_v50  ;;  %v1095_v53 = vadd.f32 %v1094_v51, %v1042_v34  ;;  %v1137_v54 = vpop.f32.mrf.mxu1  ;;  %v1710_v51 = vld [vmem:[%s2579_s1 + $0x2] ss:$8 sm:$0xf] }
 0x313   : > { %vm1146_vm0 = vcmp.ge.f32.partialorder %v1136_v26, 0.0  ;;  %v1154_v56 = vmul.f32 0.01, %v1136_v26  ;;  %v1138_v57 = vadd.f32 %v1137_v54, %v1042_v34  ;;  %v1096_v58 = vpop.f32.mrf.mxu0 }
 0x314   : > { %v1160_v59 = vsel %vm1144_vm15, %v1093_v50, %v1152_v52  ;;  %v1097_v60 = vadd.f32 %v1096_v58, %v1047_v55  ;;  %v1139_v61 = vpop.f32.mrf.mxu1  ;;  %vm1145_vm5 = vcmp.ge.f32.partialorder %v1095_v53, 0.0  ;;  %v1153_v10 = vmul.f32 0.01, %v1095_v53 }
 0x315   : > { %v1140_v62 = vadd.f32 %v1139_v61, %v1047_v55  ;;  %v1098_v63 = vpop.f32.mrf.mxu0  ;;  %1354 = vrot.lane.b32.xlu1 %v1160_v59, %s1886_s20  ;;  %v1162_v0 = vsel %vm1146_vm0, %v1136_v26, %v1154_v56  ;;  %vm1147_vm7 = vcmp.ge.f32.partialorder %v1138_v57, 0.0  ;;  %v1155_v29 = vmul.f32 0.01, %v1138_v57 }
 0x316   : > { %vm1148_vm6 = vcmp.ge.f32.partialorder %v1097_v60, 0.0  ;;  %v1156_v1 = vmul.f32 0.01, %v1097_v60  ;;  %v1099_v2 = vadd.f32 %v1098_v63, %v1047_v55  ;;  %v1141_v3 = vpop.f32.mrf.mxu1  ;;  %v1161_v31 = vsel %vm1145_vm5, %v1095_v53, %v1153_v10 }
 0x317   : > { %v1158_v4 = vmul.f32 0.01, %v1140_v62  ;;  %v1142_v5 = vadd.f32 %v1141_v3, %v1047_v55  ;;  %vm1150_vm8 = vcmp.ge.f32.partialorder %v1140_v62, 0.0  ;;  %v1163_v11 = vsel %vm1147_vm7, %v1138_v57, %v1155_v29 }
 0x318   : > { %v1164_v6 = vsel %vm1148_vm6, %v1097_v60, %v1156_v1  ;;  %vm1149_vm9 = vcmp.ge.f32.partialorder %v1099_v2, 0.0  ;;  %v1157_v7 = vmul.f32 0.01, %v1099_v2  ;;  %v1395_v55 = vrot.slane %v1711_v27, %v2093_v22 }
 0x319   : > { %vm1151_vm10 = vcmp.ge.f32.partialorder %v1142_v5, 0.0  ;;  %v1159_v8 = vmul.f32 0.01, %v1142_v5  ;;  %1356 = vrot.lane.b32.xlu0 %v1164_v6, %s1886_s20  ;;  %1362 = vrot.lane.b32.xlu1 %v1162_v0, %s1886_s20  ;;  %v1166_v12 = vsel %vm1150_vm8, %v1140_v62, %v1158_v4  ;;  %v1481_v13 = vpack.c.bf16 %v1164_v6, %v1160_v59 }
 0x31a   : > { %v1165_v9 = vsel %vm1149_vm9, %v1099_v2, %v1157_v7  ;;  %v1483_v15 = vpack.c.bf16 %v1166_v12, %v1162_v0  ;;  %v1391_v56 = vrot.slane %v1711_v27, %v2096_v24  ;;  %v1325_v60 = vrot.slane %v1710_v51, %v2083_v18 }
 0x31b   : > { %v1167_v32 = vsel %vm1151_vm10, %v1142_v5, %v1159_v8  ;;  %v1482_v30 = vpack.c.bf16 %v1165_v9, %v1161_v31 }
 0x31c   : > { %v1484_v14 = vpack.c.bf16 %v1167_v32, %v1163_v11 }
 0x31d   : > { %1364 = vrot.lane.b32.xlu0 %v1166_v12, %s1886_s20  ;;  %1500 = vmatprep.subr.bf16.mxu0 %v1482_v30  ;;  %v1709_v30 = vld [vmem:[%s2579_s1 + $0x1] ss:$8 sm:$0xf] }
 0x31e   : > { %1292 = vrot.lane.b32.xlu1 %v1160_v59, %s1885_s28  ;;  %1501 = vmatpush1.bf16.msra.mxu0 %v1481_v13 }
 0x31f   : > { %1541 = vmatprep.subr.bf16.mxu1 %v1484_v14 }
 0x320   : > { %1542 = vmatpush1.bf16.msra.mxu1 %v1483_v15 }
 0x321   : > { %1294 = vrot.lane.b32.xlu0 %v1164_v6, %s1885_s28 }
 0x322   : > { %1300 = vrot.lane.b32.xlu1 %v1162_v0, %s1885_s28 }
 0x325   : > { %1302 = vrot.lane.b32.xlu0 %v1166_v12, %s1885_s28 }
 0x326   : > { %1230 = vrot.lane.b32.xlu1 %v1160_v59, %s1889_s16 }
 0x329   : > { %1232 = vrot.lane.b32.xlu0 %v1164_v6, %s1889_s16 }
 0x32a   : > { %1238 = vrot.lane.b32.xlu1 %v1162_v0, %s1889_s16 }
 0x32d   : > { %1240 = vrot.lane.b32.xlu0 %v1166_v12, %s1889_s16 }
 0x32e   : > { %1168 = vrot.lane.b32.xlu1 %v1160_v59, %s1887_s14 }
 0x331   : > { %1170 = vrot.lane.b32.xlu0 %v1164_v6, %s1887_s14 }
 0x332   : > { %1176 = vrot.lane.b32.xlu1 %v1162_v0, %s1887_s14 }
 0x335   : > { %1178 = vrot.lane.b32.xlu0 %v1166_v12, %s1887_s14  ;;  %v1333_v12 = vrot.slane %v1710_v51, %v2093_v22 }
 0x336   : > { %1358 = vrot.lane.b32.xlu1 %v1161_v31, %s1886_s20 }
 0x339   : > { %1360 = vrot.lane.b32.xlu0 %v1165_v9, %s1886_s20 }
 0x33a   : > { %1366 = vrot.lane.b32.xlu1 %v1163_v11, %s1886_s20 }
 0x33d   : > { %1368 = vrot.lane.b32.xlu0 %v1167_v32, %s1886_s20  ;;  %s1820_s20 = sshll.u32 %s1890_s19, 4  ;;  %s1821_s20 = int_to_ptr.vmem [resolvable:$false] %s1820_s20 }
 0x33e   : > { %1296 = vrot.lane.b32.xlu1 %v1161_v31, %s1885_s28  ;;  %s1822_s17 = scalar_lea.vmem %s1821_s20, 1024 }
 0x341   : > { %1298 = vrot.lane.b32.xlu0 %v1165_v9, %s1885_s28 }
 0x342   : > { %1304 = vrot.lane.b32.xlu1 %v1163_v11, %s1885_s28 }
 0x345   : > { %1306 = vrot.lane.b32.xlu0 %v1167_v32, %s1885_s28 }
 0x346   : > { %1234 = vrot.lane.b32.xlu1 %v1161_v31, %s1889_s16 }
 0x349   : > { %1236 = vrot.lane.b32.xlu0 %v1165_v9, %s1889_s16 }
 0x34a   : > { %1242 = vrot.lane.b32.xlu1 %v1163_v11, %s1889_s16 }
 0x34d   : > { %1244 = vrot.lane.b32.xlu0 %v1167_v32, %s1889_s16 }
 0x34e   : > { %1172 = vrot.lane.b32.xlu1 %v1161_v31, %s1887_s14 }
 0x351   : > { %1174 = vrot.lane.b32.xlu0 %v1165_v9, %s1887_s14 }
 0x352   : > { %1180 = vrot.lane.b32.xlu1 %v1163_v11, %s1887_s14  ;;  %v1321_v11 = vrot.slane %v1710_v51, %v2091_v21 }
 0x355   : > { %1182 = vrot.lane.b32.xlu0 %v1167_v32, %s1887_s14  ;;  %s351_s14 = scalar_lea.vmem [#allocation6], %s1691_s25 }
 0x356   : > { %1488 = vperm.xlu1 %1781, %v1485_v16   ;;  %s1610_s29 = sshll.u32 %s351_s14, 4  ;;  %s2529_s29 = int_to_ptr.vmem [resolvable:$true] %s1610_s29 }
 0x357   : > { %s1816_s26 = scalar_lea.vmem %s2529_s29, 512  ;;  %p1823_p5 = scmp.lt.s32.totalorder %s2529_s29, %s1821_s20 }
 0x358   : > { %p1817_p11 = scmp.ne.s32.totalorder %s2529_s29, %s1816_s26  ;;  %p1824_p7 = scmp.lt.s32.totalorder %s1822_s17, %s1816_s26 }
 0x359   : > { %1579 = vperm.xlu0 %1780, %v1576_v19   ;;  %v1329_v19 = vrot.slane %v1710_v51, %v2096_v24 }
 0x35a   : > { %p1818_p13 = pnand %p1817_p11, %p2599_p12  ;;  %p1825_p8 = por %p1824_p7, %p1823_p5 }
 0x35c   : > { %p1819_p4 = pneg %p1818_p13 }
 0x35e   : > { %p1826_p10 = pnand %p1825_p8, %p1819_p4 }
 0x387   : > { %v1355_v20 = vpop.permute.xlu1 %1354 }
 0x38b   : > { %v1357_v23 = vpop.permute.xlu0 %1356  ;;  %v1363_v36 = vpop.permute.xlu1 %1362 }
 0x38f   : > { %v1365_v38 = vpop.permute.xlu0 %1364 }
 0x390   : > { %v1293_v39 = vpop.permute.xlu1 %1292 }
 0x393   : > { %v2381_v40 = vpop.permute.xlu0 %1294 }
 0x394   : > { %v2383_v41 = vpop.permute.xlu1 %1300 }
 0x397   : > { %v2385_v42 = vpop.permute.xlu0 %1302 }
 0x398   : > { %v2387_v25 = vpop.permute.xlu1 %1230 }
 0x39b   : > { %v2389_v43 = vpop.permute.xlu0 %1232 }
 0x39c   : > { %v2391_v44 = vpop.permute.xlu1 %1238 }
 0x39f   : > { %v2393_v45 = vpop.permute.xlu0 %1240 }
 0x3a0   : > { %v2395_v33 = vpop.permute.xlu1 %1168 }
 0x3a3   : > { %v2397_v46 = vpop.permute.xlu0 %1170 }
 0x3a4   : > { %v2399_v47 = vpop.permute.xlu1 %1176 }
 0x3a7   : > { %v2404_v35 = vpop.permute.xlu0 %1178 }
 0x3a8   : > { %v1359_v48 = vpop.permute.xlu1 %1358 }
 0x3a9   : > { %v1374_v34 = vsel %vm501_vm2, %v1355_v20, %v1359_v48  ;;  %v1372_v10 = vsel %vm501_vm2, %v1359_v48, %v1363_v36 }
 0x3aa   : > { %v1401_v52 = vmul.f32 %v1387_v49, %v1374_v34  ;;  %v1402_v6 = vmul.f32 %v1391_v56, %v1372_v10 }
 0x3ab   : > { %v1361_v37 = vpop.permute.xlu0 %1360 }
 0x3ac   : > { %v1375_v50 = vsel %vm501_vm2, %v1357_v23, %v1361_v37  ;;  %v1367_v26 = vpop.permute.xlu1 %1366  ;;  %v1373_v53 = vsel %vm501_vm2, %v1361_v37, %v1365_v38 }
 0x3ad   : > { %v1405_v54 = vmul.f32 %v1387_v49, %v1375_v50  ;;  %v1370_v57 = vsel %vm501_vm2, %v1363_v36, %v1367_v26  ;;  %v1376_v58 = vsel %vm501_vm2, %v1367_v26, %v1355_v20  ;;  %v1406_v62 = vmul.f32 %v1391_v56, %v1373_v53 }
 0x3ae   : > { %v1400_v2 = vmul.f32 %v1383_v28, %v1376_v58  ;;  %v1403_v3 = vmul.f32 %v1395_v55, %v1370_v57  ;;  %v1271_v56 = vrot.slane %v1709_v30, %v2093_v22  ;;  %v1192_v58 = vld [vmem:[%s2579_s1] ss:$8 sm:$0xf] }
 0x3af   : > { %v1369_v59 = vpop.permute.xlu0 %1368  ;;  %v1478_v61 = vpack.c.bf16 %v1405_v54, %v1401_v52  ;;  %v1479_v13 = vpack.c.bf16 %v1406_v62, %v1402_v6  ;;  %v1267_v62 = vrot.slane %v1709_v30, %v2096_v24 }
 0x3b0   : > { %v1371_v63 = vsel %vm501_vm2, %v1365_v38, %v1369_v59  ;;  %v1377_v0 = vsel %vm501_vm2, %v1369_v59, %v1357_v23  ;;  %v1297_v1 = vpop.permute.xlu1 %1296  ;;  %v1263_v38 = vrot.slane %v1709_v30, %v2083_v18 }
 0x3b1   : > { %v1404_v29 = vmul.f32 %v1383_v28, %v1377_v0  ;;  %v1407_v4 = vmul.f32 %v1395_v55, %v1371_v63  ;;  %1502 = vmatprep.subr.bf16.mxu0 %v1478_v61  ;;  %v1312_v5 = vsel %vm457_vm1, %v1293_v39, %v1297_v1  ;;  %v1310_v48 = vsel %vm457_vm1, %v1297_v1, %v2383_v41 }
 0x3b2   : > { %v1339_v14 = vmul.f32 %v1325_v60, %v1312_v5 }
 0x3b3   : > { %v1477_v7 = vpack.c.bf16 %v1404_v29, %v1400_v2  ;;  %v1299_v8 = vpop.permute.xlu0 %1298  ;;  %v1480_v31 = vpack.c.bf16 %v1407_v4, %v1403_v3  ;;  %v1201_v2 = vrot.slane %v1192_v58, %v2083_v18 }
 0x3b4   : > { %v1313_v9 = vsel %vm457_vm1, %v2381_v40, %v1299_v8  ;;  %v1305_v32 = vpop.permute.xlu1 %1304  ;;  %v1311_v15 = vsel %vm457_vm1, %v1299_v8, %v2385_v42 }
 0x3b5   : > { %v1343_v16 = vmul.f32 %v1325_v60, %v1313_v9  ;;  %1503 = vmatpush1.bf16.msra.mxu0 %v1477_v7  ;;  %v1308_v20 = vsel %vm457_vm1, %v2383_v41, %v1305_v32  ;;  %v1314_v23 = vsel %vm457_vm1, %v1305_v32, %v1293_v39  ;;  %1543 = vmatprep.subr.bf16.mxu1 %v1480_v31 }
 0x3b6   : > { %1544 = vmatpush1.bf16.msra.mxu1 %v1479_v13  ;;  %v1344_v49 = vmul.f32 %v1329_v19, %v1311_v15  ;;  %v1338_v50 = vmul.f32 %v1321_v11, %v1314_v23  ;;  %v1341_v28 = vmul.f32 %v1333_v12, %v1308_v20  ;;  %v1340_v41 = vmul.f32 %v1329_v19, %v1310_v48 }
 0x3b7   : > { %v1307_v36 = vpop.permute.xlu0 %1306  ;;  %v1474_v27 = vpack.c.bf16 %v1343_v16, %v1339_v14  ;;  %v1205_v20 = vrot.slane %v1192_v58, %v2096_v24 }
 0x3b8   : > { %v1309_v34 = vsel %vm457_vm1, %v2385_v42, %v1307_v36  ;;  %v1315_v37 = vsel %vm457_vm1, %v1307_v36, %v2381_v40  ;;  %v1235_v39 = vpop.permute.xlu1 %1234  ;;  %v1259_v40 = vrot.slane %v1709_v30, %v2091_v21  ;;  %v1475_v59 = vpack.c.bf16 %v1344_v49, %v1340_v41 }
 0x3b9   : > { %v1342_v26 = vmul.f32 %v1321_v11, %v1315_v37  ;;  %v1345_v51 = vmul.f32 %v1333_v12, %v1309_v34  ;;  %1504 = vmatprep.subr.bf16.mxu0 %v1474_v27  ;;  %v1250_v52 = vsel %vm413_vm4, %v2387_v25, %v1235_v39  ;;  %v1248_v29 = vsel %vm413_vm4, %v1235_v39, %v2391_v44 }
 0x3ba   : > { %v1277_v60 = vmul.f32 %v1263_v38, %v1250_v52  ;;  %v1209_v30 = vrot.slane %v1192_v58, %v2093_v22 }
 0x3bb   : > { %v1473_v53 = vpack.c.bf16 %v1342_v26, %v1338_v50  ;;  %v1237_v54 = vpop.permute.xlu0 %1236  ;;  %v1476_v55 = vpack.c.bf16 %v1345_v51, %v1341_v28  ;;  %v1784_v51 = vld [vmem:[%s2045_s27] sm:$0xff] }
 0x3bc   : > { %v1251_v42 = vsel %vm413_vm4, %v2389_v43, %v1237_v54  ;;  %v1243_v57 = vpop.permute.xlu1 %1242  ;;  %v1249_v61 = vsel %vm413_vm4, %v1237_v54, %v2393_v45  ;;  %v1785_v54 = vld [vmem:[%s2045_s27 + $0x10] sm:$0xff] }
 0x3bd   : > { %v1281_v10 = vmul.f32 %v1263_v38, %v1251_v42  ;;  %1505 = vmatpush1.bf16.msra.mxu0 %v1473_v53  ;;  %v1246_v63 = vsel %vm413_vm4, %v2391_v44, %v1243_v57  ;;  %v1252_v0 = vsel %vm413_vm4, %v1243_v57, %v2387_v25  ;;  %1545 = vmatprep.subr.bf16.mxu1 %v1476_v55 }
 0x3be   : > { %1546 = vmatpush1.bf16.msra.mxu1 %v1475_v59  ;;  %v1282_v4 = vmul.f32 %v1267_v62, %v1249_v61  ;;  %v1276_v7 = vmul.f32 %v1259_v40, %v1252_v0  ;;  %v1279_v8 = vmul.f32 %v1271_v56, %v1246_v63  ;;  %v1278_v44 = vmul.f32 %v1267_v62, %v1248_v29  ;;  %v1787_v61 = vld [vmem:[%s2045_s27 + $0x18] sm:$0xff] }
 0x3bf   : > { %v1245_v1 = vpop.permute.xlu0 %1244  ;;  %v1470_v3 = vpack.c.bf16 %v1281_v10, %v1277_v60 }
 0x3c0   : > { %v1247_v5 = vsel %vm413_vm4, %v2393_v45, %v1245_v1  ;;  %v1253_v6 = vsel %vm413_vm4, %v1245_v1, %v2389_v43  ;;  %v1173_v25 = vpop.permute.xlu1 %1172  ;;  %v1197_v43 = vrot.slane %v1192_v58, %v2091_v21  ;;  %v1471_v14 = vpack.c.bf16 %v1282_v4, %v1278_v44 }
 0x3c1   : > { %v1280_v31 = vmul.f32 %v1259_v40, %v1253_v6  ;;  %v1283_v9 = vmul.f32 %v1271_v56, %v1247_v5  ;;  %1506 = vmatprep.subr.bf16.mxu0 %v1470_v3  ;;  %v1188_v18 = vsel %vm370_vm3, %v2395_v33, %v1173_v25  ;;  %v1186_v22 = vsel %vm370_vm3, %v1173_v25, %v2399_v47  ;;  %v1786_v56 = vld [vmem:[%s2045_s27 + $0x8] sm:$0xff]  ;;  %s2534_s27 = scalar_lea.hbm %s2587_s9, %s1725_s24 }
 0x3c2   : > { %v1215_v15 = vmul.f32 %v1201_v2, %v1188_v18  ;;  %v1216_v39 = vmul.f32 %v1205_v20, %v1186_v22 }
 0x3c3   : > { %v1469_v11 = vpack.c.bf16 %v1280_v31, %v1276_v7  ;;  %v1175_v12 = vpop.permute.xlu0 %1174  ;;  %v1472_v32 = vpack.c.bf16 %v1283_v9, %v1279_v8 }
 0x3c4   : > { %v1189_v45 = vsel %vm370_vm3, %v2397_v46, %v1175_v12  ;;  %v1181_v13 = vpop.permute.xlu1 %1180  ;;  %v1187_v16 = vsel %vm370_vm3, %v1175_v12, %v2404_v35 }
 0x3c5   : > { %v1219_v19 = vmul.f32 %v1201_v2, %v1189_v45  ;;  %1507 = vmatpush1.bf16.msra.mxu0 %v1469_v11  ;;  %v1184_v23 = vsel %vm370_vm3, %v2399_v47, %v1181_v13  ;;  %v1190_v21 = vsel %vm370_vm3, %v1181_v13, %v2395_v33  ;;  %1547 = vmatprep.subr.bf16.mxu1 %v1472_v32 }
 0x3c6   : > { %1548 = vmatpush1.bf16.msra.mxu1 %v1471_v14  ;;  %v1220_v27 = vmul.f32 %v1205_v20, %v1187_v16  ;;  %v1214_v49 = vmul.f32 %v1197_v43, %v1190_v21  ;;  %v1217_v34 = vmul.f32 %v1209_v30, %v1184_v23 }
 0x3c7   : > { %v1183_v36 = vpop.permute.xlu0 %1182  ;;  %v1466_v38 = vpack.c.bf16 %v1219_v19, %v1215_v15 }
 0x3c8   : > { %v1185_v24 = vsel %vm370_vm3, %v2404_v35, %v1183_v36  ;;  %v1191_v48 = vsel %vm370_vm3, %v1183_v36, %v2397_v46  ;;  %v1467_v28 = vpack.c.bf16 %v1220_v27, %v1216_v39  ;;  %v1424_v35 = vld [vmem:[%s2584_s6] sm:$0xf] }
 0x3c9   : > { %v1218_v33 = vmul.f32 %v1197_v43, %v1191_v48  ;;  %v1221_v37 = vmul.f32 %v1209_v30, %v1185_v24  ;;  %1508 = vmatprep.subr.bf16.mxu0 %v1466_v38 }
 0x3cb   : > { %v1465_v47 = vpack.c.bf16 %v1218_v33, %v1214_v49  ;;  %v1468_v50 = vpack.c.bf16 %v1221_v37, %v1217_v34 }
 0x3cd   : > { %1509 = vmatpush1.bf16.msra.mxu0 %v1465_v47  ;;  %1549 = vmatprep.subr.bf16.mxu1 %v1468_v50 }
 0x3ce   : > { %1550 = vmatpush1.bf16.msra.mxu1 %v1467_v28 }
 0x3d0   : > { %1712 = vmatmul.mubr.msk.bf16.vlgmr.msra.gmra.mxu0 %vm1054_vm14, %v1424_v35 }
 0x3d1   : > { %1713 = vmatmul.mubr.msk.bf16.vlgmr.msra.gmra.mxu1 %vm1054_vm14, %v1424_v35  ;;  %v1489_v46 = vpop.permute.xlu1 %1488 }
 0x3d4   : > { %v1580_v17 = vpop.permute.xlu0 %1579 }
 0x3d5   : > { %v1582_v52 = vmul.f32 %v1784_v51, %v1580_v17  ;;  %v1584_v55 = vmul.f32 %v1785_v54, %v1580_v17  ;;  %v1583_v57 = vmul.f32 %v1786_v56, %v1580_v17  ;;  %v1585_v10 = vmul.f32 %v1787_v61, %v1580_v17 }
 0x490   : > { %v1528_v26 = vpop.f32.mrf.mxu0 }
 0x491   : > { %v1529_v41 = vadd.f32 %v1528_v26, %v1489_v46  ;;  %v1569_v53 = vpop.f32.mrf.mxu1 }
 0x492   : > { %v1570_v42 = vadd.f32 %v1569_v53, %v1489_v46  ;;  %v1530_v40 = vpop.f32.mrf.mxu0 }
 0x493   : > { %v1586_v58 = vadd.f32 %v1582_v52, %v1529_v41  ;;  %v1531_v59 = vadd.f32 %v1530_v40, %v1489_v46  ;;  %v1571_v60 = vpop.f32.mrf.mxu1 }
 0x494   : > { %v1588_v62 = vadd.f32 %v1584_v55, %v1570_v42  ;;  %v1572_v63 = vadd.f32 %v1571_v60, %v1489_v46  ;;  %v1532_v0 = vpop.f32.mrf.mxu0 }
 0x495   : > { %1590 = vst [vmem:[%s351_s14] sm:$0xff] %v1586_v58  ;;  %v1587_v1 = vadd.f32 %v1583_v57, %v1531_v59  ;;  %v1573_v2 = vpop.f32.mrf.mxu1 }
 0x496   : > { %1714 = vst [vmem:[%s351_s14 + $0x10] sm:$0xff] %v1588_v62  ;;  %v1589_v3 = vadd.f32 %v1585_v10, %v1572_v63  ;;  %v1533_v29 = vpop.f32.mrf.mxu0 }
 0x497   : > { %1591 = vst [vmem:[%s351_s14 + $0x8] sm:$0xff] %v1587_v1  ;;  %v1574_v4 = vpop.f32.mrf.mxu1 }
 0x498   : > { %1715 = vst [vmem:[%s351_s14 + $0x18] sm:$0xff] %v1589_v3 }
 0x499   : > { %1829 = shalt.err (!%p1826_p10)
}
 0x49a   : > { %s1830_s28 = scalar_lea.hbm %s2534_s27, 512  ;;  %s1834_s24 = scalar_lea.hbm %s2587_s9, 1024 }
 0x49b   : > { %p1831_p0 = scmp.ne.s32.totalorder %s2534_s27, %s1830_s28  ;;  %p1835_p1 = scmp.lt.s32.totalorder %s2534_s27, %s2587_s9 }
 0x49c   : > { %p1836_p3 = scmp.lt.s32.totalorder %s1834_s24, %s1830_s28 }
 0x49d   : > { %p1832_p2 = pnand %p1831_p0, %p2599_p12 }
 0x49e   : > { %p1837_p6 = por %p1836_p3, %p1835_p1 }
 0x49f   : > { %p1833_p9 = pneg %p1832_p2 }
 0x4a1   : > { %p1838_p11 = pnand %p1837_p6, %p1833_p9 }
 0x4a3   : > { %1841 = shalt.err (!%p1838_p11)
}
 0x4a4   : > { %s1891_s26 = smov 256  }
 0x4a5   : > { %1728 = dma.vmem_to_hbm [thread:$0]  (%p2599_p12), %s2529_s29, 512, %s2534_s27, %s1596_s18, %s1891_s26, %s1891_s26, %s1889_s16  }
 0x4a6 PF: > { %s1625_s19 = sand.u32 1, %s1868_s30   ;;  %p2600_p13 = scmp.ne.s32.totalorder %s2596_s22, 0 }
 0x4a7   : > { %p2601_p4 = scmp.ge.s32.totalorder %s1880_s12, 2  ;;  %s1626_s20 = scalar_lea.sflag [#allocation5], %s1625_s19 }
 0x4a9   : > { %p1735_p5 = pnand %p2601_p4, %p2600_p13 }
 0x4ab   : > { %p1736_p7 = pneg %p1735_p5 }
 0x4ad   : > { %1863 = dma.done.wait (%p1736_p7), %s1626_s20, 512  }
 0x4ae   : > { %1865 = vsyncadd (%p1736_p7), %s1626_s20, 4294966784  ;;  %s2602_s21 = sld [smem:[#allocation9_spill]]  ;;  %p22_p8 = scmp.ge.s32.totalorder %s1967_s15, 4  }
 0x4af   : > { %s2603_s11 = sld [smem:[#allocation10_spill]]  ;;  %s2604_s30 = smov %s1872_s10 }
 0x4b0   : > { %s2606_s12 = smov %s1967_s15  ;;  %24 = sbr.rel (!%p22_p8) target bundleno = 5 (0x5), region = 106 }
 0x4b4   : > { %s2605_s10 = smov %s2602_s21 }
 0x4b5   :  { %1631 = vsyncpa [#allocation4], 1 }
 0x4b6   :  { %1633 = vsyncpa [#allocation4 + $0x1], 1 }
 0x4b7   :  { %1634 = vsyncpa [#allocation5], 1 }
 0x4b8   :  { %1636 = vsyncpa [#allocation5 + $0x1], 1 }

</bundles_post_ra>
